<compile_context>
chip_gen: v7x
topology: tpu7x:2x2x1
jax: 0.10.0
libtpu: 0.0.40
codegen_flags: <defaults>
</compile_context>

<pallas_src>
import jax
import jax.numpy as jnp
from jax import lax
from jax.experimental import pallas as pl
from jax.experimental.pallas import tpu as pltpu  # noqa: F401 (TPU backend)

# ------------------------- configuration (small) -------------------------
IN_CH = 4
IMG = 16
PATCH = 8
HIDDEN = 32
MLP_DIM = 64
NUM_LAYERS = 2
NUM_HEADS = 4
HEAD_DIM = HIDDEN // NUM_HEADS
N_PATCHES = (IMG // PATCH) ** 2          # 4
SEQ = N_PATCHES + 1                      # +1 cls token  -> 5
N_PAD = 8                                # token axis padded to one sublane group
N_PAD_SHIFT = 3                          # log2(N_PAD); N_PAD must be a power of 2
P_FLAT = IN_CH * PATCH * PATCH           # flattened conv patch
EPS = 1e-5                               # torch.nn.LayerNorm default
SCALE = HEAD_DIM ** (-0.5)

# dtype fed to the MXU (bf16-native on v5e/v6e/v7x; f32 accumulation is kept
# via preferred_element_type).  Elementwise math (LN/softmax/GELU) stays f32.
# Set to jnp.float32 for tight parity with an fp32 PyTorch reference.
MXU_DTYPE = jnp.bfloat16


# ----------------------------- kernel helpers -----------------------------
def _layernorm(x, gamma, beta):
    mu = jnp.mean(x, axis=-1, keepdims=True)
    var = jnp.mean((x - mu) ** 2, axis=-1, keepdims=True)
    return (x - mu) * lax.rsqrt(var + EPS) * gamma + beta


def _gelu_tanh(x):
    # tanh-approx GELU (EUP tanh).  |delta| vs torch.nn.GELU's exact erf ~1e-3.
    # TODO(synk): exact-erf GELU if strict parity with nn.GELU is required.
    c = 0.7978845608028654  # sqrt(2/pi)
    return 0.5 * x * (1.0 + jnp.tanh(c * (x + 0.044715 * x * x * x)))


def _mm(a, b):
    return jnp.dot(a.astype(MXU_DTYPE), b.astype(MXU_DTYPE),
                   preferred_element_type=jnp.float32)


def _ein(spec, a, b):
    return jnp.einsum(spec, a.astype(MXU_DTYPE), b.astype(MXU_DTYPE),
                      preferred_element_type=jnp.float32)


# -------------------- one-time host-side parameter packing -----------------
def pack_params(params):
    """Stack / fuse all weights once, outside the per-call jit path."""
    L, C, M = NUM_LAYERS, HIDDEN, MLP_DIM

    # per-token additive term: cls token row 0, conv bias + pos-emb for patch
    # rows, zeros for pad rows.
    bias_tok = jnp.concatenate(
        [params['cls'][0],
         params['pe_b'] + params['pos'],
         jnp.zeros((N_PAD - SEQ, C), jnp.float32)], axis=0)          # (N_PAD, C)
    # globals: row0 = final-LN gamma, row1 = final-LN beta, rows 2.. = bias_tok
    gvec = jnp.concatenate([params['ln_g'], params['ln_b'], bias_tok], axis=0)

    def stack(k):
        return jnp.stack([lp[k] for lp in params['layers']], axis=0)

    def pad_c(v):                         # (L,1,C) -> (L,1,M), zero-pad lanes
        return jnp.pad(v, ((0, 0), (0, 0), (0, M - C)))

    # all small per-layer vectors in one (L, 8, M) slab:
    # rows 0..5 = ln1_g, ln1_b, bo, ln2_g, ln2_b, b2 (lanes 0:C); row 6 = b1.
    lvec = jnp.concatenate([
        pad_c(stack('ln1_g')), pad_c(stack('ln1_b')), pad_c(stack('bo')),
        pad_c(stack('ln2_g')), pad_c(stack('ln2_b')), pad_c(stack('b2')),
        stack('b1'), jnp.zeros((L, 1, M), jnp.float32)], axis=1)

    # matmul weights, pre-cast to the MXU dtype:
    wqkv = stack('wqkv').astype(MXU_DTYPE)                           # (L, C, 3C)
    w1 = stack('w1').astype(MXU_DTYPE)                               # (L, C, M)
    # wo (rows 0:C) and w2 (rows C:C+M) stacked along sublanes.
    w_out = jnp.concatenate([stack('wo'), stack('w2')], axis=1).astype(MXU_DTYPE)

    return {'pe_w': params['pe_w'].astype(MXU_DTYPE),                # (P_FLAT, C)
            'gvec': gvec, 'lvec': lvec,
            'wqkv': wqkv, 'w1': w1, 'w_out': w_out}


# ------------------------------- forward ----------------------------------
@jax.jit
def vit_forward(x, pk):
    """x: (B, IN_CH, IMG, IMG) NCHW, pk: pack_params output -> (x_out, hiddens)."""
    B = x.shape[0]
    T = B * N_PAD                         # total padded tokens
    ph = IMG // PATCH

    # kernel==stride conv as im2col: patch order row-major over (H',W'),
    # per-patch flatten in (C, kh, kw) order (matches conv weight layout).
    patches = x.reshape(B, IN_CH, ph, PATCH, ph, PATCH)
    patches = patches.transpose(0, 2, 4, 1, 3, 5).reshape(B, N_PATCHES, P_FLAT)
    # row 0 of each batch block = cls slot, rows 1..Np = patches, pad rows = 0.
    xpatch = jnp.zeros((B, N_PAD, P_FLAT), jnp.float32)
    xpatch = xpatch.at[:, 1:1 + N_PATCHES, :].set(patches).reshape(T, P_FLAT)

    # ------------------------------ fused kernel ----------------------------
    def vit_kernel(xpatch_ref, gvec_ref, pe_w_ref, lvec_ref,
                   wqkv_ref, w1_ref, wout_ref, out_ref, hid_ref):
        gv = gvec_ref[...]                                           # (2+N_PAD, C)
        bias_tok = gv[2:, :]                                         # (N_PAD, C)

        # additive attention mask, built in-kernel (no (T,T) HBM operand):
        # attend only within the same batch element and only to real keys.
        tq = lax.broadcasted_iota(jnp.int32, (T, T), 0)
        tk = lax.broadcasted_iota(jnp.int32, (T, T), 1)
        same_batch = (tq >> N_PAD_SHIFT) == (tk >> N_PAD_SHIFT)
        valid_key = (tk & (N_PAD - 1)) < SEQ
        mask = jnp.where(same_batch & valid_key, 0.0, -1e30)

        # patch embedding + cls token + pos emb: one matmul for the whole batch
        xtok = _mm(xpatch_ref[...], pe_w_ref[...]) + jnp.tile(bias_tok, (B, 1))

        for li in range(NUM_LAYERS):                                 # static unroll
            lv = lvec_ref[li]                                        # (8, M)
            ln1_g, ln1_b = lv[0:1, :HIDDEN], lv[1:2, :HIDDEN]
            bo = lv[2:3, :HIDDEN]
            ln2_g, ln2_b = lv[3:4, :HIDDEN], lv[4:5, :HIDDEN]
            b2 = lv[5:6, :HIDDEN]
            b1 = lv[6:7, :]                                          # (1, M)
            wom = wout_ref[li]                                       # (C+M, C)
            wo_l, w2_l = wom[:HIDDEN], wom[HIDDEN:]

            # ---------------- self attention (SABlock) ----------------
            h1 = _layernorm(xtok, ln1_g, ln1_b)                      # (T, C)
            qkv = _mm(h1, wqkv_ref[li])                              # (T, 3C), 1 MXU push

            def heads(base):                                         # -> (H, T, D)
                return jnp.stack(
                    [qkv[:, base + hh * HEAD_DIM: base + (hh + 1) * HEAD_DIM]
                     for hh in range(NUM_HEADS)], axis=0)

            q = heads(0)
            k = heads(HIDDEN)
            v = heads(2 * HIDDEN)
            s = _ein('hqd,hkd->hqk', q, k) * SCALE + mask[None]      # (H, T, T)
            s = s - jnp.max(s, axis=-1, keepdims=True)
            p = jnp.exp(s)
            # softmax denominator via EUP approx-reciprocal + multiply
            p = p * pl.reciprocal(jnp.sum(p, axis=-1, keepdims=True), approx=True)
            o = _ein('hqk,hkd->hqd', p, v)                           # (H, T, D)
            ocat = jnp.concatenate([o[hh] for hh in range(NUM_HEADS)], axis=-1)
            xtok = xtok + _mm(ocat, wo_l) + bo                       # residual 1

            # ---------------------------- MLP --------------------------
            h2 = _layernorm(xtok, ln2_g, ln2_b)
            m = _gelu_tanh(_mm(h2, w1_ref[li]) + b1)
            xtok = xtok + _mm(m, w2_l) + b2                          # residual 2

            hid_ref[li] = xtok                                       # flat slab store

        out_ref[...] = _layernorm(xtok, gv[0:1, :], gv[1:2, :])

    # No grid: everything fits in a single VMEM-resident block (~50 KB).
    # NOTE(v7x): for non-trivial B (>=8), add a batch-tile grid axis with
    # dimension_semantics=("parallel",) so the two TensorCores split the batch
    # (each tile is then automatically block-diagonal in attention).
    # TODO(synk): at real ViT-B sizes (hidden 768 / mlp 3072) move the layer
    # loop onto a grid axis ("arbitrary", weight BlockSpecs lambda l: (l, ...))
    # with vmem_limit_bytes set, instead of all-layers-resident weights.
    out_flat, hid_flat = pl.pallas_call(
        vit_kernel,
        out_shape=(jax.ShapeDtypeStruct((T, HIDDEN), jnp.float32),
                   jax.ShapeDtypeStruct((NUM_LAYERS, T, HIDDEN), jnp.float32)),
    )(xpatch, pk['gvec'], pk['pe_w'], pk['lvec'],
      pk['wqkv'], pk['w1'], pk['w_out'])

    out = out_flat.reshape(B, N_PAD, HIDDEN)[:, :SEQ]
    hid = hid_flat.reshape(NUM_LAYERS, B, N_PAD, HIDDEN)
    hidden_states_out = [hid[i, :, :SEQ] for i in range(NUM_LAYERS)]
    # classification=False (default) -> no classification head.
    # TODO(synk): enhance/fuse token pruning (topk/gather/complement_idx) and
    # the CSA mask branch are never executed with default rates / CSA=False and
    # are not implemented as Pallas kernels here.
    return out, hidden_states_out


# ------------------------------ parameters --------------------------------
def init_params(key):
    ks = jax.random.split(key, 4 + NUM_LAYERS)
    params = {
        # conv patch-embedding weight pre-flattened/transposed: (P_FLAT, HIDDEN)
        'pe_w': jax.random.normal(ks[0], (P_FLAT, HIDDEN), jnp.float32) * 0.02,
        'pe_b': jax.random.normal(ks[1], (1, HIDDEN), jnp.float32) * 0.02,
        'pos':  jax.random.normal(ks[2], (N_PATCHES, HIDDEN), jnp.float32) * 0.02,
        'cls':  jnp.zeros((1, 1, HIDDEN), jnp.float32),     # nn.Parameter(zeros)
        'ln_g': jnp.ones((1, HIDDEN), jnp.float32),
        'ln_b': jnp.zeros((1, HIDDEN), jnp.float32),
        'layers': [],
    }
    for i in range(NUM_LAYERS):
        lk = jax.random.split(ks[4 + i], 6)
        params['layers'].append({
            'ln1_g': jnp.ones((1, HIDDEN), jnp.float32),
            'ln1_b': jnp.zeros((1, HIDDEN), jnp.float32),
            # qkv: Linear(C, 3C, bias=False) stored transposed: (C, 3C),
            # column layout = [q | k | v], head-major within each (matches the
            # reference Rearrange 'b h (qkv l d) -> qkv b l h d').
            'wqkv': jax.random.normal(lk[0], (HIDDEN, 3 * HIDDEN), jnp.float32) * 0.02,
            # out_proj: Linear(C, C) stored transposed
            'wo':   jax.random.normal(lk[1], (HIDDEN, HIDDEN), jnp.float32) * 0.02,
            'bo':   jax.random.normal(lk[2], (1, HIDDEN), jnp.float32) * 0.02,
            'ln2_g': jnp.ones((1, HIDDEN), jnp.float32),
            'ln2_b': jnp.zeros((1, HIDDEN), jnp.float32),
            # MLP: Linear(C, mlp) + GELU + Linear(mlp, C), stored transposed
            'w1':   jax.random.normal(lk[3], (HIDDEN, MLP_DIM), jnp.float32) * 0.02,
            'b1':   jax.random.normal(lk[4], (1, MLP_DIM), jnp.float32) * 0.02,
            'w2':   jax.random.normal(lk[5], (MLP_DIM, HIDDEN), jnp.float32) * 0.02,
            'b2':   jnp.zeros((1, HIDDEN), jnp.float32),
        })
    return params


# --------------------------------- main ------------------------------------
if __name__ == "__main__":
    key = jax.random.PRNGKey(0)
    kx, kp = jax.random.split(key)
    x = jax.random.normal(kx, (2, IN_CH, IMG, IMG), jnp.float32)
    params = init_params(kp)
    packed = pack_params(params)          # one-time packing, outside the jit path

    out, hidden_states_out = vit_forward(x, packed)
    jax.block_until_ready(out)
    jax.block_until_ready(hidden_states_out)

    assert out.shape == (2, SEQ, HIDDEN)
    assert len(hidden_states_out) == NUM_LAYERS
    assert all(h.shape == (2, SEQ, HIDDEN) for h in hidden_states_out)
    assert bool(jnp.all(jnp.isfinite(out)))
    print("KERNEL_OK")
</pallas_src>

<mosaic_0001>
module attributes {stable_mosaic.version = 11 : i64} {
  func.func @vit_kernel(%arg0: memref<16x256xf32, #tpu.memory_space<vmem>>, %arg1: memref<10x32xf32, #tpu.memory_space<vmem>>, %arg2: memref<256x32xbf16, #tpu.memory_space<vmem>>, %arg3: memref<2x8x64xf32, #tpu.memory_space<vmem>>, %arg4: memref<2x32x96xbf16, #tpu.memory_space<vmem>>, %arg5: memref<2x32x64xbf16, #tpu.memory_space<vmem>>, %arg6: memref<2x96x32xbf16, #tpu.memory_space<vmem>>, %arg7: memref<16x32xf32, #tpu.memory_space<vmem>>, %arg8: memref<2x16x32xf32, #tpu.memory_space<vmem>>) attributes {dimension_semantics = [], scalar_prefetch = 0 : i64, scratch_operands = 0 : i64, tpu.core_type = #tpu.core_type<tc>} {
    %c0 = arith.constant 0 : index
    %c0_0 = arith.constant 0 : index
    %0 = vector.load %arg1[%c0, %c0_0] : memref<10x32xf32, #tpu.memory_space<vmem>>, vector<10x32xf32>
    %1 = vector.extract_strided_slice %0 {offsets = [2, 0], sizes = [8, 32], strides = [1, 1]} : vector<10x32xf32> to vector<8x32xf32>
    %2 = tpu.iota {dimensions = array<i32: 0>} : vector<16x16xi32>
    %3 = tpu.iota {dimensions = array<i32: 1>} : vector<16x16xi32>
    %c3_i32 = arith.constant 3 : i32
    %4 = vector.broadcast %c3_i32 : i32 to vector<16x16xi32>
    %5 = arith.shrsi %2, %4 : vector<16x16xi32>
    %c3_i32_1 = arith.constant 3 : i32
    %6 = vector.broadcast %c3_i32_1 : i32 to vector<16x16xi32>
    %7 = arith.shrsi %3, %6 : vector<16x16xi32>
    %8 = arith.cmpi eq, %5, %7 : vector<16x16xi32>
    %c7_i32 = arith.constant 7 : i32
    %9 = vector.broadcast %c7_i32 : i32 to vector<16x16xi32>
    %10 = arith.andi %3, %9 : vector<16x16xi32>
    %c5_i32 = arith.constant 5 : i32
    %11 = vector.broadcast %c5_i32 : i32 to vector<16x16xi32>
    %12 = arith.cmpi slt, %10, %11 : vector<16x16xi32>
    %13 = arith.andi %8, %12 : vector<16x16xi1>
    %cst = arith.constant 0.000000e+00 : f32
    %cst_2 = arith.constant -1.000000e+30 : f32
    %14 = vector.broadcast %cst : f32 to vector<16x16xf32>
    %15 = vector.broadcast %cst_2 : f32 to vector<16x16xf32>
    %16 = arith.select %13, %14, %15 : vector<16x16xi1>, vector<16x16xf32>
    %c0_3 = arith.constant 0 : index
    %c0_4 = arith.constant 0 : index
    %17 = vector.load %arg0[%c0_3, %c0_4] : memref<16x256xf32, #tpu.memory_space<vmem>>, vector<16x256xf32>
    %c0_5 = arith.constant 0 : index
    %c0_6 = arith.constant 0 : index
    %18 = vector.load %arg2[%c0_5, %c0_6] : memref<256x32xbf16, #tpu.memory_space<vmem>>, vector<256x32xbf16>
    %19 = arith.truncf %17 : vector<16x256xf32> to vector<16x256xbf16>
    %cst_7 = arith.constant dense<0.000000e+00> : vector<16x32xf32>
    %20 = tpu.matmul %19, %18, %cst_7 {dimension_numbers = #tpu.dot_dimension_numbers<[1], [0], [0], [1], [0, 0, 1, 1], [], []>} : vector<16x256xbf16>, vector<256x32xbf16>, vector<16x32xf32> -> vector<16x32xf32>
    %21 = tpu.concatenate %1, %1 in 0 : vector<8x32xf32>, vector<8x32xf32> -> vector<16x32xf32>
    %22 = arith.addf %20, %21 : vector<16x32xf32>
    %c0_8 = arith.constant 0 : index
    %c0_9 = arith.constant 0 : index
    %c0_10 = arith.constant 0 : index
    %23 = vector.load %arg3[%c0_8, %c0_9, %c0_10] : memref<2x8x64xf32, #tpu.memory_space<vmem>>, vector<1x8x64xf32>
    %24 = vector.shape_cast %23 : vector<1x8x64xf32> to vector<8x64xf32>
    %25 = vector.extract_strided_slice %24 {offsets = [0, 0], sizes = [1, 32], strides = [1, 1]} : vector<8x64xf32> to vector<1x32xf32>
    %26 = vector.extract_strided_slice %24 {offsets = [1, 0], sizes = [1, 32], strides = [1, 1]} : vector<8x64xf32> to vector<1x32xf32>
    %27 = vector.extract_strided_slice %24 {offsets = [2, 0], sizes = [1, 32], strides = [1, 1]} : vector<8x64xf32> to vector<1x32xf32>
    %28 = vector.extract_strided_slice %24 {offsets = [3, 0], sizes = [1, 32], strides = [1, 1]} : vector<8x64xf32> to vector<1x32xf32>
    %29 = vector.extract_strided_slice %24 {offsets = [4, 0], sizes = [1, 32], strides = [1, 1]} : vector<8x64xf32> to vector<1x32xf32>
    %30 = vector.extract_strided_slice %24 {offsets = [5, 0], sizes = [1, 32], strides = [1, 1]} : vector<8x64xf32> to vector<1x32xf32>
    %31 = vector.extract_strided_slice %24 {offsets = [6, 0], sizes = [1, 64], strides = [1, 1]} : vector<8x64xf32> to vector<1x64xf32>
    %c0_11 = arith.constant 0 : index
    %c0_12 = arith.constant 0 : index
    %c0_13 = arith.constant 0 : index
    %32 = vector.load %arg6[%c0_11, %c0_12, %c0_13] : memref<2x96x32xbf16, #tpu.memory_space<vmem>>, vector<1x96x32xbf16>
    %33 = vector.shape_cast %32 : vector<1x96x32xbf16> to vector<96x32xbf16>
    %34 = vector.extract_strided_slice %33 {offsets = [0, 0], sizes = [32, 32], strides = [1, 1]} : vector<96x32xbf16> to vector<32x32xbf16>
    %35 = vector.extract_strided_slice %33 {offsets = [32, 0], sizes = [64, 32], strides = [1, 1]} : vector<96x32xbf16> to vector<64x32xbf16>
    %cst_14 = arith.constant dense<0.000000e+00> : vector<16xf32>
    %36 = vector.multi_reduction <add>, %22, %cst_14 [1] : vector<16x32xf32> to vector<16xf32>
    %37 = vector.shape_cast %36 : vector<16xf32> to vector<16x1xf32>
    %cst_15 = arith.constant 3.200000e+01 : f32
    %38 = vector.broadcast %cst_15 : f32 to vector<16x1xf32>
    %39 = arith.divf %37, %38 : vector<16x1xf32>
    %40 = vector.broadcast %39 : vector<16x1xf32> to vector<16x32xf32>
    %41 = arith.subf %22, %40 : vector<16x32xf32>
    %42 = arith.mulf %41, %41 : vector<16x32xf32>
    %cst_16 = arith.constant dense<0.000000e+00> : vector<16xf32>
    %43 = vector.multi_reduction <add>, %42, %cst_16 [1] : vector<16x32xf32> to vector<16xf32>
    %44 = vector.shape_cast %43 : vector<16xf32> to vector<16x1xf32>
    %cst_17 = arith.constant 3.200000e+01 : f32
    %45 = vector.broadcast %cst_17 : f32 to vector<16x1xf32>
    %46 = arith.divf %44, %45 : vector<16x1xf32>
    %47 = vector.broadcast %39 : vector<16x1xf32> to vector<16x32xf32>
    %48 = arith.subf %22, %47 : vector<16x32xf32>
    %cst_18 = arith.constant 9.99999974E-6 : f32
    %49 = vector.broadcast %cst_18 : f32 to vector<16x1xf32>
    %50 = arith.addf %46, %49 : vector<16x1xf32>
    %51 = math.rsqrt %50 : vector<16x1xf32>
    %52 = vector.broadcast %51 : vector<16x1xf32> to vector<16x32xf32>
    %53 = arith.mulf %48, %52 : vector<16x32xf32>
    %54 = vector.broadcast %25 : vector<1x32xf32> to vector<16x32xf32>
    %55 = arith.mulf %53, %54 : vector<16x32xf32>
    %56 = vector.broadcast %26 : vector<1x32xf32> to vector<16x32xf32>
    %57 = arith.addf %55, %56 : vector<16x32xf32>
    %c0_19 = arith.constant 0 : index
    %c0_20 = arith.constant 0 : index
    %c0_21 = arith.constant 0 : index
    %58 = vector.load %arg4[%c0_19, %c0_20, %c0_21] : memref<2x32x96xbf16, #tpu.memory_space<vmem>>, vector<1x32x96xbf16>
    %59 = vector.shape_cast %58 : vector<1x32x96xbf16> to vector<32x96xbf16>
    %60 = arith.truncf %57 : vector<16x32xf32> to vector<16x32xbf16>
    %cst_22 = arith.constant dense<0.000000e+00> : vector<16x96xf32>
    %61 = tpu.matmul %60, %59, %cst_22 {dimension_numbers = #tpu.dot_dimension_numbers<[1], [0], [0], [1], [0, 0, 1, 1], [], []>} : vector<16x32xbf16>, vector<32x96xbf16>, vector<16x96xf32> -> vector<16x96xf32>
    %62 = vector.extract_strided_slice %61 {offsets = [0, 0], sizes = [16, 8], strides = [1, 1]} : vector<16x96xf32> to vector<16x8xf32>
    %63 = vector.extract_strided_slice %61 {offsets = [0, 8], sizes = [16, 8], strides = [1, 1]} : vector<16x96xf32> to vector<16x8xf32>
    %64 = vector.extract_strided_slice %61 {offsets = [0, 16], sizes = [16, 8], strides = [1, 1]} : vector<16x96xf32> to vector<16x8xf32>
    %65 = vector.extract_strided_slice %61 {offsets = [0, 24], sizes = [16, 8], strides = [1, 1]} : vector<16x96xf32> to vector<16x8xf32>
    %66 = vector.shape_cast %62 : vector<16x8xf32> to vector<1x16x8xf32>
    %67 = vector.shape_cast %63 : vector<16x8xf32> to vector<1x16x8xf32>
    %68 = vector.shape_cast %64 : vector<16x8xf32> to vector<1x16x8xf32>
    %69 = vector.shape_cast %65 : vector<16x8xf32> to vector<1x16x8xf32>
    %70 = tpu.concatenate %66, %67, %68, %69 in 0 : vector<1x16x8xf32>, vector<1x16x8xf32>, vector<1x16x8xf32>, vector<1x16x8xf32> -> vector<4x16x8xf32>
    %71 = vector.extract_strided_slice %61 {offsets = [0, 32], sizes = [16, 8], strides = [1, 1]} : vector<16x96xf32> to vector<16x8xf32>
    %72 = vector.extract_strided_slice %61 {offsets = [0, 40], sizes = [16, 8], strides = [1, 1]} : vector<16x96xf32> to vector<16x8xf32>
    %73 = vector.extract_strided_slice %61 {offsets = [0, 48], sizes = [16, 8], strides = [1, 1]} : vector<16x96xf32> to vector<16x8xf32>
    %74 = vector.extract_strided_slice %61 {offsets = [0, 56], sizes = [16, 8], strides = [1, 1]} : vector<16x96xf32> to vector<16x8xf32>
    %75 = vector.shape_cast %71 : vector<16x8xf32> to vector<1x16x8xf32>
    %76 = vector.shape_cast %72 : vector<16x8xf32> to vector<1x16x8xf32>
    %77 = vector.shape_cast %73 : vector<16x8xf32> to vector<1x16x8xf32>
    %78 = vector.shape_cast %74 : vector<16x8xf32> to vector<1x16x8xf32>
    %79 = tpu.concatenate %75, %76, %77, %78 in 0 : vector<1x16x8xf32>, vector<1x16x8xf32>, vector<1x16x8xf32>, vector<1x16x8xf32> -> vector<4x16x8xf32>
    %80 = vector.extract_strided_slice %61 {offsets = [0, 64], sizes = [16, 8], strides = [1, 1]} : vector<16x96xf32> to vector<16x8xf32>
    %81 = vector.extract_strided_slice %61 {offsets = [0, 72], sizes = [16, 8], strides = [1, 1]} : vector<16x96xf32> to vector<16x8xf32>
    %82 = vector.extract_strided_slice %61 {offsets = [0, 80], sizes = [16, 8], strides = [1, 1]} : vector<16x96xf32> to vector<16x8xf32>
    %83 = vector.extract_strided_slice %61 {offsets = [0, 88], sizes = [16, 8], strides = [1, 1]} : vector<16x96xf32> to vector<16x8xf32>
    %84 = vector.shape_cast %80 : vector<16x8xf32> to vector<1x16x8xf32>
    %85 = vector.shape_cast %81 : vector<16x8xf32> to vector<1x16x8xf32>
    %86 = vector.shape_cast %82 : vector<16x8xf32> to vector<1x16x8xf32>
    %87 = vector.shape_cast %83 : vector<16x8xf32> to vector<1x16x8xf32>
    %88 = tpu.concatenate %84, %85, %86, %87 in 0 : vector<1x16x8xf32>, vector<1x16x8xf32>, vector<1x16x8xf32>, vector<1x16x8xf32> -> vector<4x16x8xf32>
    %89 = arith.truncf %70 : vector<4x16x8xf32> to vector<4x16x8xbf16>
    %90 = arith.truncf %79 : vector<4x16x8xf32> to vector<4x16x8xbf16>
    "tpu.trace_start"() <{level = 10 : i32, message = "hqd,hkd->hqk"}> : () -> ()
    %cst_23 = arith.constant dense<0.000000e+00> : vector<4x16x16xf32>
    %91 = tpu.matmul %89, %90, %cst_23 {dimension_numbers = #tpu.dot_dimension_numbers<[2], [2], [1], [1], [0, 0, 0, 1, 1, 1], [0], [0]>} : vector<4x16x8xbf16>, vector<4x16x8xbf16>, vector<4x16x16xf32> -> vector<4x16x16xf32>
    "tpu.trace_stop"() : () -> ()
    %cst_24 = arith.constant 0.353553385 : f32
    %92 = vector.broadcast %cst_24 : f32 to vector<4x16x16xf32>
    %93 = arith.mulf %91, %92 : vector<4x16x16xf32>
    %94 = vector.shape_cast %16 : vector<16x16xf32> to vector<1x16x16xf32>
    %95 = vector.broadcast %94 : vector<1x16x16xf32> to vector<4x16x16xf32>
    %96 = arith.addf %93, %95 : vector<4x16x16xf32>
    %cst_25 = arith.constant dense<0xFF800000> : vector<4x16xf32>
    %97 = vector.multi_reduction <maximumf>, %96, %cst_25 [2] : vector<4x16x16xf32> to vector<4x16xf32>
    %98 = vector.shape_cast %97 : vector<4x16xf32> to vector<4x16x1xf32>
    %99 = vector.broadcast %98 : vector<4x16x1xf32> to vector<4x16x16xf32>
    %100 = arith.subf %96, %99 : vector<4x16x16xf32>
    %101 = math.exp %100 : vector<4x16x16xf32>
    %cst_26 = arith.constant dense<0.000000e+00> : vector<4x16xf32>
    %102 = vector.multi_reduction <add>, %101, %cst_26 [2] : vector<4x16x16xf32> to vector<4x16xf32>
    %103 = vector.shape_cast %102 : vector<4x16xf32> to vector<4x16x1xf32>
    %104 = tpu.reciprocal %103 {approx = true} : vector<4x16x1xf32> -> vector<4x16x1xf32>
    %105 = vector.broadcast %104 : vector<4x16x1xf32> to vector<4x16x16xf32>
    %106 = arith.mulf %101, %105 : vector<4x16x16xf32>
    %107 = arith.truncf %106 : vector<4x16x16xf32> to vector<4x16x16xbf16>
    %108 = arith.truncf %88 : vector<4x16x8xf32> to vector<4x16x8xbf16>
    "tpu.trace_start"() <{level = 10 : i32, message = "hqk,hkd->hqd"}> : () -> ()
    %cst_27 = arith.constant dense<0.000000e+00> : vector<4x16x8xf32>
    %109 = tpu.matmul %107, %108, %cst_27 {dimension_numbers = #tpu.dot_dimension_numbers<[2], [1], [1], [2], [0, 0, 0, 1, 1, 2], [0], [0]>} : vector<4x16x16xbf16>, vector<4x16x8xbf16>, vector<4x16x8xf32> -> vector<4x16x8xf32>
    "tpu.trace_stop"() : () -> ()
    %110 = vector.extract_strided_slice %109 {offsets = [0, 0, 0], sizes = [1, 16, 8], strides = [1, 1, 1]} : vector<4x16x8xf32> to vector<1x16x8xf32>
    %111 = vector.shape_cast %110 : vector<1x16x8xf32> to vector<16x8xf32>
    %112 = vector.extract_strided_slice %109 {offsets = [1, 0, 0], sizes = [1, 16, 8], strides = [1, 1, 1]} : vector<4x16x8xf32> to vector<1x16x8xf32>
    %113 = vector.shape_cast %112 : vector<1x16x8xf32> to vector<16x8xf32>
    %114 = vector.extract_strided_slice %109 {offsets = [2, 0, 0], sizes = [1, 16, 8], strides = [1, 1, 1]} : vector<4x16x8xf32> to vector<1x16x8xf32>
    %115 = vector.shape_cast %114 : vector<1x16x8xf32> to vector<16x8xf32>
    %116 = vector.extract_strided_slice %109 {offsets = [3, 0, 0], sizes = [1, 16, 8], strides = [1, 1, 1]} : vector<4x16x8xf32> to vector<1x16x8xf32>
    %117 = vector.shape_cast %116 : vector<1x16x8xf32> to vector<16x8xf32>
    %118 = tpu.concatenate %111, %113, %115, %117 in 1 : vector<16x8xf32>, vector<16x8xf32>, vector<16x8xf32>, vector<16x8xf32> -> vector<16x32xf32>
    %119 = arith.truncf %118 : vector<16x32xf32> to vector<16x32xbf16>
    %cst_28 = arith.constant dense<0.000000e+00> : vector<16x32xf32>
    %120 = tpu.matmul %119, %34, %cst_28 {dimension_numbers = #tpu.dot_dimension_numbers<[1], [0], [0], [1], [0, 0, 1, 1], [], []>} : vector<16x32xbf16>, vector<32x32xbf16>, vector<16x32xf32> -> vector<16x32xf32>
    %121 = arith.addf %22, %120 : vector<16x32xf32>
    %122 = vector.broadcast %27 : vector<1x32xf32> to vector<16x32xf32>
    %123 = arith.addf %121, %122 : vector<16x32xf32>
    %cst_29 = arith.constant dense<0.000000e+00> : vector<16xf32>
    %124 = vector.multi_reduction <add>, %123, %cst_29 [1] : vector<16x32xf32> to vector<16xf32>
    %125 = vector.shape_cast %124 : vector<16xf32> to vector<16x1xf32>
    %cst_30 = arith.constant 3.200000e+01 : f32
    %126 = vector.broadcast %cst_30 : f32 to vector<16x1xf32>
    %127 = arith.divf %125, %126 : vector<16x1xf32>
    %128 = vector.broadcast %127 : vector<16x1xf32> to vector<16x32xf32>
    %129 = arith.subf %123, %128 : vector<16x32xf32>
    %130 = arith.mulf %129, %129 : vector<16x32xf32>
    %cst_31 = arith.constant dense<0.000000e+00> : vector<16xf32>
    %131 = vector.multi_reduction <add>, %130, %cst_31 [1] : vector<16x32xf32> to vector<16xf32>
    %132 = vector.shape_cast %131 : vector<16xf32> to vector<16x1xf32>
    %cst_32 = arith.constant 3.200000e+01 : f32
    %133 = vector.broadcast %cst_32 : f32 to vector<16x1xf32>
    %134 = arith.divf %132, %133 : vector<16x1xf32>
    %135 = vector.broadcast %127 : vector<16x1xf32> to vector<16x32xf32>
    %136 = arith.subf %123, %135 : vector<16x32xf32>
    %cst_33 = arith.constant 9.99999974E-6 : f32
    %137 = vector.broadcast %cst_33 : f32 to vector<16x1xf32>
    %138 = arith.addf %134, %137 : vector<16x1xf32>
    %139 = math.rsqrt %138 : vector<16x1xf32>
    %140 = vector.broadcast %139 : vector<16x1xf32> to vector<16x32xf32>
    %141 = arith.mulf %136, %140 : vector<16x32xf32>
    %142 = vector.broadcast %28 : vector<1x32xf32> to vector<16x32xf32>
    %143 = arith.mulf %141, %142 : vector<16x32xf32>
    %144 = vector.broadcast %29 : vector<1x32xf32> to vector<16x32xf32>
    %145 = arith.addf %143, %144 : vector<16x32xf32>
    %c0_34 = arith.constant 0 : index
    %c0_35 = arith.constant 0 : index
    %c0_36 = arith.constant 0 : index
    %146 = vector.load %arg5[%c0_34, %c0_35, %c0_36] : memref<2x32x64xbf16, #tpu.memory_space<vmem>>, vector<1x32x64xbf16>
    %147 = vector.shape_cast %146 : vector<1x32x64xbf16> to vector<32x64xbf16>
    %148 = arith.truncf %145 : vector<16x32xf32> to vector<16x32xbf16>
    %cst_37 = arith.constant dense<0.000000e+00> : vector<16x64xf32>
    %149 = tpu.matmul %148, %147, %cst_37 {dimension_numbers = #tpu.dot_dimension_numbers<[1], [0], [0], [1], [0, 0, 1, 1], [], []>} : vector<16x32xbf16>, vector<32x64xbf16>, vector<16x64xf32> -> vector<16x64xf32>
    %150 = vector.broadcast %31 : vector<1x64xf32> to vector<16x64xf32>
    %151 = arith.addf %149, %150 : vector<16x64xf32>
    %cst_38 = arith.constant 5.000000e-01 : f32
    %152 = vector.broadcast %cst_38 : f32 to vector<16x64xf32>
    %153 = arith.mulf %152, %151 : vector<16x64xf32>
    %cst_39 = arith.constant 4.471500e-02 : f32
    %154 = vector.broadcast %cst_39 : f32 to vector<16x64xf32>
    %155 = arith.mulf %154, %151 : vector<16x64xf32>
    %156 = arith.mulf %155, %151 : vector<16x64xf32>
    %157 = arith.mulf %156, %151 : vector<16x64xf32>
    %158 = arith.addf %151, %157 : vector<16x64xf32>
    %cst_40 = arith.constant 0.797884583 : f32
    %159 = vector.broadcast %cst_40 : f32 to vector<16x64xf32>
    %160 = arith.mulf %159, %158 : vector<16x64xf32>
    %161 = math.tanh %160 : vector<16x64xf32>
    %cst_41 = arith.constant 1.000000e+00 : f32
    %162 = vector.broadcast %cst_41 : f32 to vector<16x64xf32>
    %163 = arith.addf %162, %161 : vector<16x64xf32>
    %164 = arith.mulf %153, %163 : vector<16x64xf32>
    %165 = arith.truncf %164 : vector<16x64xf32> to vector<16x64xbf16>
    %cst_42 = arith.constant dense<0.000000e+00> : vector<16x32xf32>
    %166 = tpu.matmul %165, %35, %cst_42 {dimension_numbers = #tpu.dot_dimension_numbers<[1], [0], [0], [1], [0, 0, 1, 1], [], []>} : vector<16x64xbf16>, vector<64x32xbf16>, vector<16x32xf32> -> vector<16x32xf32>
    %167 = arith.addf %123, %166 : vector<16x32xf32>
    %168 = vector.broadcast %30 : vector<1x32xf32> to vector<16x32xf32>
    %169 = arith.addf %167, %168 : vector<16x32xf32>
    %c0_43 = arith.constant 0 : index
    %c0_44 = arith.constant 0 : index
    %c0_45 = arith.constant 0 : index
    %170 = vector.load %arg8[%c0_43, %c0_44, %c0_45] : memref<2x16x32xf32, #tpu.memory_space<vmem>>, vector<1x16x32xf32>
    %171 = vector.shape_cast %170 : vector<1x16x32xf32> to vector<16x32xf32>
    %172 = vector.shape_cast %169 : vector<16x32xf32> to vector<1x16x32xf32>
    tpu.vector_store %arg8[%c0_43, %c0_44, %c0_45], %172 {strides = array<i32>} : memref<2x16x32xf32, #tpu.memory_space<vmem>>, vector<1x16x32xf32>,
    %c1 = arith.constant 1 : index
    %c0_46 = arith.constant 0 : index
    %c0_47 = arith.constant 0 : index
    %173 = vector.load %arg3[%c1, %c0_46, %c0_47] : memref<2x8x64xf32, #tpu.memory_space<vmem>>, vector<1x8x64xf32>
    %174 = vector.shape_cast %173 : vector<1x8x64xf32> to vector<8x64xf32>
    %175 = vector.extract_strided_slice %174 {offsets = [0, 0], sizes = [1, 32], strides = [1, 1]} : vector<8x64xf32> to vector<1x32xf32>
    %176 = vector.extract_strided_slice %174 {offsets = [1, 0], sizes = [1, 32], strides = [1, 1]} : vector<8x64xf32> to vector<1x32xf32>
    %177 = vector.extract_strided_slice %174 {offsets = [2, 0], sizes = [1, 32], strides = [1, 1]} : vector<8x64xf32> to vector<1x32xf32>
    %178 = vector.extract_strided_slice %174 {offsets = [3, 0], sizes = [1, 32], strides = [1, 1]} : vector<8x64xf32> to vector<1x32xf32>
    %179 = vector.extract_strided_slice %174 {offsets = [4, 0], sizes = [1, 32], strides = [1, 1]} : vector<8x64xf32> to vector<1x32xf32>
    %180 = vector.extract_strided_slice %174 {offsets = [5, 0], sizes = [1, 32], strides = [1, 1]} : vector<8x64xf32> to vector<1x32xf32>
    %181 = vector.extract_strided_slice %174 {offsets = [6, 0], sizes = [1, 64], strides = [1, 1]} : vector<8x64xf32> to vector<1x64xf32>
    %c1_48 = arith.constant 1 : index
    %c0_49 = arith.constant 0 : index
    %c0_50 = arith.constant 0 : index
    %182 = vector.load %arg6[%c1_48, %c0_49, %c0_50] : memref<2x96x32xbf16, #tpu.memory_space<vmem>>, vector<1x96x32xbf16>
    %183 = vector.shape_cast %182 : vector<1x96x32xbf16> to vector<96x32xbf16>
    %184 = vector.extract_strided_slice %183 {offsets = [0, 0], sizes = [32, 32], strides = [1, 1]} : vector<96x32xbf16> to vector<32x32xbf16>
    %185 = vector.extract_strided_slice %183 {offsets = [32, 0], sizes = [64, 32], strides = [1, 1]} : vector<96x32xbf16> to vector<64x32xbf16>
    %cst_51 = arith.constant dense<0.000000e+00> : vector<16xf32>
    %186 = vector.multi_reduction <add>, %169, %cst_51 [1] : vector<16x32xf32> to vector<16xf32>
    %187 = vector.shape_cast %186 : vector<16xf32> to vector<16x1xf32>
    %cst_52 = arith.constant 3.200000e+01 : f32
    %188 = vector.broadcast %cst_52 : f32 to vector<16x1xf32>
    %189 = arith.divf %187, %188 : vector<16x1xf32>
    %190 = vector.broadcast %189 : vector<16x1xf32> to vector<16x32xf32>
    %191 = arith.subf %169, %190 : vector<16x32xf32>
    %192 = arith.mulf %191, %191 : vector<16x32xf32>
    %cst_53 = arith.constant dense<0.000000e+00> : vector<16xf32>
    %193 = vector.multi_reduction <add>, %192, %cst_53 [1] : vector<16x32xf32> to vector<16xf32>
    %194 = vector.shape_cast %193 : vector<16xf32> to vector<16x1xf32>
    %cst_54 = arith.constant 3.200000e+01 : f32
    %195 = vector.broadcast %cst_54 : f32 to vector<16x1xf32>
    %196 = arith.divf %194, %195 : vector<16x1xf32>
    %197 = vector.broadcast %189 : vector<16x1xf32> to vector<16x32xf32>
    %198 = arith.subf %169, %197 : vector<16x32xf32>
    %cst_55 = arith.constant 9.99999974E-6 : f32
    %199 = vector.broadcast %cst_55 : f32 to vector<16x1xf32>
    %200 = arith.addf %196, %199 : vector<16x1xf32>
    %201 = math.rsqrt %200 : vector<16x1xf32>
    %202 = vector.broadcast %201 : vector<16x1xf32> to vector<16x32xf32>
    %203 = arith.mulf %198, %202 : vector<16x32xf32>
    %204 = vector.broadcast %175 : vector<1x32xf32> to vector<16x32xf32>
    %205 = arith.mulf %203, %204 : vector<16x32xf32>
    %206 = vector.broadcast %176 : vector<1x32xf32> to vector<16x32xf32>
    %207 = arith.addf %205, %206 : vector<16x32xf32>
    %c1_56 = arith.constant 1 : index
    %c0_57 = arith.constant 0 : index
    %c0_58 = arith.constant 0 : index
    %208 = vector.load %arg4[%c1_56, %c0_57, %c0_58] : memref<2x32x96xbf16, #tpu.memory_space<vmem>>, vector<1x32x96xbf16>
    %209 = vector.shape_cast %208 : vector<1x32x96xbf16> to vector<32x96xbf16>
    %210 = arith.truncf %207 : vector<16x32xf32> to vector<16x32xbf16>
    %cst_59 = arith.constant dense<0.000000e+00> : vector<16x96xf32>
    %211 = tpu.matmul %210, %209, %cst_59 {dimension_numbers = #tpu.dot_dimension_numbers<[1], [0], [0], [1], [0, 0, 1, 1], [], []>} : vector<16x32xbf16>, vector<32x96xbf16>, vector<16x96xf32> -> vector<16x96xf32>
    %212 = vector.extract_strided_slice %211 {offsets = [0, 0], sizes = [16, 8], strides = [1, 1]} : vector<16x96xf32> to vector<16x8xf32>
    %213 = vector.extract_strided_slice %211 {offsets = [0, 8], sizes = [16, 8], strides = [1, 1]} : vector<16x96xf32> to vector<16x8xf32>
    %214 = vector.extract_strided_slice %211 {offsets = [0, 16], sizes = [16, 8], strides = [1, 1]} : vector<16x96xf32> to vector<16x8xf32>
    %215 = vector.extract_strided_slice %211 {offsets = [0, 24], sizes = [16, 8], strides = [1, 1]} : vector<16x96xf32> to vector<16x8xf32>
    %216 = vector.shape_cast %212 : vector<16x8xf32> to vector<1x16x8xf32>
    %217 = vector.shape_cast %213 : vector<16x8xf32> to vector<1x16x8xf32>
    %218 = vector.shape_cast %214 : vector<16x8xf32> to vector<1x16x8xf32>
    %219 = vector.shape_cast %215 : vector<16x8xf32> to vector<1x16x8xf32>
    %220 = tpu.concatenate %216, %217, %218, %219 in 0 : vector<1x16x8xf32>, vector<1x16x8xf32>, vector<1x16x8xf32>, vector<1x16x8xf32> -> vector<4x16x8xf32>
    %221 = vector.extract_strided_slice %211 {offsets = [0, 32], sizes = [16, 8], strides = [1, 1]} : vector<16x96xf32> to vector<16x8xf32>
    %222 = vector.extract_strided_slice %211 {offsets = [0, 40], sizes = [16, 8], strides = [1, 1]} : vector<16x96xf32> to vector<16x8xf32>
    %223 = vector.extract_strided_slice %211 {offsets = [0, 48], sizes = [16, 8], strides = [1, 1]} : vector<16x96xf32> to vector<16x8xf32>
    %224 = vector.extract_strided_slice %211 {offsets = [0, 56], sizes = [16, 8], strides = [1, 1]} : vector<16x96xf32> to vector<16x8xf32>
    %225 = vector.shape_cast %221 : vector<16x8xf32> to vector<1x16x8xf32>
    %226 = vector.shape_cast %222 : vector<16x8xf32> to vector<1x16x8xf32>
    %227 = vector.shape_cast %223 : vector<16x8xf32> to vector<1x16x8xf32>
    %228 = vector.shape_cast %224 : vector<16x8xf32> to vector<1x16x8xf32>
    %229 = tpu.concatenate %225, %226, %227, %228 in 0 : vector<1x16x8xf32>, vector<1x16x8xf32>, vector<1x16x8xf32>, vector<1x16x8xf32> -> vector<4x16x8xf32>
    %230 = vector.extract_strided_slice %211 {offsets = [0, 64], sizes = [16, 8], strides = [1, 1]} : vector<16x96xf32> to vector<16x8xf32>
    %231 = vector.extract_strided_slice %211 {offsets = [0, 72], sizes = [16, 8], strides = [1, 1]} : vector<16x96xf32> to vector<16x8xf32>
    %232 = vector.extract_strided_slice %211 {offsets = [0, 80], sizes = [16, 8], strides = [1, 1]} : vector<16x96xf32> to vector<16x8xf32>
    %233 = vector.extract_strided_slice %211 {offsets = [0, 88], sizes = [16, 8], strides = [1, 1]} : vector<16x96xf32> to vector<16x8xf32>
    %234 = vector.shape_cast %230 : vector<16x8xf32> to vector<1x16x8xf32>
    %235 = vector.shape_cast %231 : vector<16x8xf32> to vector<1x16x8xf32>
    %236 = vector.shape_cast %232 : vector<16x8xf32> to vector<1x16x8xf32>
    %237 = vector.shape_cast %233 : vector<16x8xf32> to vector<1x16x8xf32>
    %238 = tpu.concatenate %234, %235, %236, %237 in 0 : vector<1x16x8xf32>, vector<1x16x8xf32>, vector<1x16x8xf32>, vector<1x16x8xf32> -> vector<4x16x8xf32>
    %239 = arith.truncf %220 : vector<4x16x8xf32> to vector<4x16x8xbf16>
    %240 = arith.truncf %229 : vector<4x16x8xf32> to vector<4x16x8xbf16>
    "tpu.trace_start"() <{level = 10 : i32, message = "hqd,hkd->hqk"}> : () -> ()
    %cst_60 = arith.constant dense<0.000000e+00> : vector<4x16x16xf32>
    %241 = tpu.matmul %239, %240, %cst_60 {dimension_numbers = #tpu.dot_dimension_numbers<[2], [2], [1], [1], [0, 0, 0, 1, 1, 1], [0], [0]>} : vector<4x16x8xbf16>, vector<4x16x8xbf16>, vector<4x16x16xf32> -> vector<4x16x16xf32>
    "tpu.trace_stop"() : () -> ()
    %cst_61 = arith.constant 0.353553385 : f32
    %242 = vector.broadcast %cst_61 : f32 to vector<4x16x16xf32>
    %243 = arith.mulf %241, %242 : vector<4x16x16xf32>
    %244 = vector.shape_cast %16 : vector<16x16xf32> to vector<1x16x16xf32>
    %245 = vector.broadcast %244 : vector<1x16x16xf32> to vector<4x16x16xf32>
    %246 = arith.addf %243, %245 : vector<4x16x16xf32>
    %cst_62 = arith.constant dense<0xFF800000> : vector<4x16xf32>
    %247 = vector.multi_reduction <maximumf>, %246, %cst_62 [2] : vector<4x16x16xf32> to vector<4x16xf32>
    %248 = vector.shape_cast %247 : vector<4x16xf32> to vector<4x16x1xf32>
    %249 = vector.broadcast %248 : vector<4x16x1xf32> to vector<4x16x16xf32>
    %250 = arith.subf %246, %249 : vector<4x16x16xf32>
    %251 = math.exp %250 : vector<4x16x16xf32>
    %cst_63 = arith.constant dense<0.000000e+00> : vector<4x16xf32>
    %252 = vector.multi_reduction <add>, %251, %cst_63 [2] : vector<4x16x16xf32> to vector<4x16xf32>
    %253 = vector.shape_cast %252 : vector<4x16xf32> to vector<4x16x1xf32>
    %254 = tpu.reciprocal %253 {approx = true} : vector<4x16x1xf32> -> vector<4x16x1xf32>
    %255 = vector.broadcast %254 : vector<4x16x1xf32> to vector<4x16x16xf32>
    %256 = arith.mulf %251, %255 : vector<4x16x16xf32>
    %257 = arith.truncf %256 : vector<4x16x16xf32> to vector<4x16x16xbf16>
    %258 = arith.truncf %238 : vector<4x16x8xf32> to vector<4x16x8xbf16>
    "tpu.trace_start"() <{level = 10 : i32, message = "hqk,hkd->hqd"}> : () -> ()
    %cst_64 = arith.constant dense<0.000000e+00> : vector<4x16x8xf32>
    %259 = tpu.matmul %257, %258, %cst_64 {dimension_numbers = #tpu.dot_dimension_numbers<[2], [1], [1], [2], [0, 0, 0, 1, 1, 2], [0], [0]>} : vector<4x16x16xbf16>, vector<4x16x8xbf16>, vector<4x16x8xf32> -> vector<4x16x8xf32>
    "tpu.trace_stop"() : () -> ()
    %260 = vector.extract_strided_slice %259 {offsets = [0, 0, 0], sizes = [1, 16, 8], strides = [1, 1, 1]} : vector<4x16x8xf32> to vector<1x16x8xf32>
    %261 = vector.shape_cast %260 : vector<1x16x8xf32> to vector<16x8xf32>
    %262 = vector.extract_strided_slice %259 {offsets = [1, 0, 0], sizes = [1, 16, 8], strides = [1, 1, 1]} : vector<4x16x8xf32> to vector<1x16x8xf32>
    %263 = vector.shape_cast %262 : vector<1x16x8xf32> to vector<16x8xf32>
    %264 = vector.extract_strided_slice %259 {offsets = [2, 0, 0], sizes = [1, 16, 8], strides = [1, 1, 1]} : vector<4x16x8xf32> to vector<1x16x8xf32>
    %265 = vector.shape_cast %264 : vector<1x16x8xf32> to vector<16x8xf32>
    %266 = vector.extract_strided_slice %259 {offsets = [3, 0, 0], sizes = [1, 16, 8], strides = [1, 1, 1]} : vector<4x16x8xf32> to vector<1x16x8xf32>
    %267 = vector.shape_cast %266 : vector<1x16x8xf32> to vector<16x8xf32>
    %268 = tpu.concatenate %261, %263, %265, %267 in 1 : vector<16x8xf32>, vector<16x8xf32>, vector<16x8xf32>, vector<16x8xf32> -> vector<16x32xf32>
    %269 = arith.truncf %268 : vector<16x32xf32> to vector<16x32xbf16>
    %cst_65 = arith.constant dense<0.000000e+00> : vector<16x32xf32>
    %270 = tpu.matmul %269, %184, %cst_65 {dimension_numbers = #tpu.dot_dimension_numbers<[1], [0], [0], [1], [0, 0, 1, 1], [], []>} : vector<16x32xbf16>, vector<32x32xbf16>, vector<16x32xf32> -> vector<16x32xf32>
    %271 = arith.addf %169, %270 : vector<16x32xf32>
    %272 = vector.broadcast %177 : vector<1x32xf32> to vector<16x32xf32>
    %273 = arith.addf %271, %272 : vector<16x32xf32>
    %cst_66 = arith.constant dense<0.000000e+00> : vector<16xf32>
    %274 = vector.multi_reduction <add>, %273, %cst_66 [1] : vector<16x32xf32> to vector<16xf32>
    %275 = vector.shape_cast %274 : vector<16xf32> to vector<16x1xf32>
    %cst_67 = arith.constant 3.200000e+01 : f32
    %276 = vector.broadcast %cst_67 : f32 to vector<16x1xf32>
    %277 = arith.divf %275, %276 : vector<16x1xf32>
    %278 = vector.broadcast %277 : vector<16x1xf32> to vector<16x32xf32>
    %279 = arith.subf %273, %278 : vector<16x32xf32>
    %280 = arith.mulf %279, %279 : vector<16x32xf32>
    %cst_68 = arith.constant dense<0.000000e+00> : vector<16xf32>
    %281 = vector.multi_reduction <add>, %280, %cst_68 [1] : vector<16x32xf32> to vector<16xf32>
    %282 = vector.shape_cast %281 : vector<16xf32> to vector<16x1xf32>
    %cst_69 = arith.constant 3.200000e+01 : f32
    %283 = vector.broadcast %cst_69 : f32 to vector<16x1xf32>
    %284 = arith.divf %282, %283 : vector<16x1xf32>
    %285 = vector.broadcast %277 : vector<16x1xf32> to vector<16x32xf32>
    %286 = arith.subf %273, %285 : vector<16x32xf32>
    %cst_70 = arith.constant 9.99999974E-6 : f32
    %287 = vector.broadcast %cst_70 : f32 to vector<16x1xf32>
    %288 = arith.addf %284, %287 : vector<16x1xf32>
    %289 = math.rsqrt %288 : vector<16x1xf32>
    %290 = vector.broadcast %289 : vector<16x1xf32> to vector<16x32xf32>
    %291 = arith.mulf %286, %290 : vector<16x32xf32>
    %292 = vector.broadcast %178 : vector<1x32xf32> to vector<16x32xf32>
    %293 = arith.mulf %291, %292 : vector<16x32xf32>
    %294 = vector.broadcast %179 : vector<1x32xf32> to vector<16x32xf32>
    %295 = arith.addf %293, %294 : vector<16x32xf32>
    %c1_71 = arith.constant 1 : index
    %c0_72 = arith.constant 0 : index
    %c0_73 = arith.constant 0 : index
    %296 = vector.load %arg5[%c1_71, %c0_72, %c0_73] : memref<2x32x64xbf16, #tpu.memory_space<vmem>>, vector<1x32x64xbf16>
    %297 = vector.shape_cast %296 : vector<1x32x64xbf16> to vector<32x64xbf16>
    %298 = arith.truncf %295 : vector<16x32xf32> to vector<16x32xbf16>
    %cst_74 = arith.constant dense<0.000000e+00> : vector<16x64xf32>
    %299 = tpu.matmul %298, %297, %cst_74 {dimension_numbers = #tpu.dot_dimension_numbers<[1], [0], [0], [1], [0, 0, 1, 1], [], []>} : vector<16x32xbf16>, vector<32x64xbf16>, vector<16x64xf32> -> vector<16x64xf32>
    %300 = vector.broadcast %181 : vector<1x64xf32> to vector<16x64xf32>
    %301 = arith.addf %299, %300 : vector<16x64xf32>
    %cst_75 = arith.constant 5.000000e-01 : f32
    %302 = vector.broadcast %cst_75 : f32 to vector<16x64xf32>
    %303 = arith.mulf %302, %301 : vector<16x64xf32>
    %cst_76 = arith.constant 4.471500e-02 : f32
    %304 = vector.broadcast %cst_76 : f32 to vector<16x64xf32>
    %305 = arith.mulf %304, %301 : vector<16x64xf32>
    %306 = arith.mulf %305, %301 : vector<16x64xf32>
    %307 = arith.mulf %306, %301 : vector<16x64xf32>
    %308 = arith.addf %301, %307 : vector<16x64xf32>
    %cst_77 = arith.constant 0.797884583 : f32
    %309 = vector.broadcast %cst_77 : f32 to vector<16x64xf32>
    %310 = arith.mulf %309, %308 : vector<16x64xf32>
    %311 = math.tanh %310 : vector<16x64xf32>
    %cst_78 = arith.constant 1.000000e+00 : f32
    %312 = vector.broadcast %cst_78 : f32 to vector<16x64xf32>
    %313 = arith.addf %312, %311 : vector<16x64xf32>
    %314 = arith.mulf %303, %313 : vector<16x64xf32>
    %315 = arith.truncf %314 : vector<16x64xf32> to vector<16x64xbf16>
    %cst_79 = arith.constant dense<0.000000e+00> : vector<16x32xf32>
    %316 = tpu.matmul %315, %185, %cst_79 {dimension_numbers = #tpu.dot_dimension_numbers<[1], [0], [0], [1], [0, 0, 1, 1], [], []>} : vector<16x64xbf16>, vector<64x32xbf16>, vector<16x32xf32> -> vector<16x32xf32>
    %317 = arith.addf %273, %316 : vector<16x32xf32>
    %318 = vector.broadcast %180 : vector<1x32xf32> to vector<16x32xf32>
    %319 = arith.addf %317, %318 : vector<16x32xf32>
    %c1_80 = arith.constant 1 : index
    %c0_81 = arith.constant 0 : index
    %c0_82 = arith.constant 0 : index
    %320 = vector.load %arg8[%c1_80, %c0_81, %c0_82] : memref<2x16x32xf32, #tpu.memory_space<vmem>>, vector<1x16x32xf32>
    %321 = vector.shape_cast %320 : vector<1x16x32xf32> to vector<16x32xf32>
    %322 = vector.shape_cast %319 : vector<16x32xf32> to vector<1x16x32xf32>
    tpu.vector_store %arg8[%c1_80, %c0_81, %c0_82], %322 {strides = array<i32>} : memref<2x16x32xf32, #tpu.memory_space<vmem>>, vector<1x16x32xf32>,
    %323 = vector.extract_strided_slice %0 {offsets = [0, 0], sizes = [1, 32], strides = [1, 1]} : vector<10x32xf32> to vector<1x32xf32>
    %324 = vector.extract_strided_slice %0 {offsets = [1, 0], sizes = [1, 32], strides = [1, 1]} : vector<10x32xf32> to vector<1x32xf32>
    %cst_83 = arith.constant dense<0.000000e+00> : vector<16xf32>
    %325 = vector.multi_reduction <add>, %319, %cst_83 [1] : vector<16x32xf32> to vector<16xf32>
    %326 = vector.shape_cast %325 : vector<16xf32> to vector<16x1xf32>
    %cst_84 = arith.constant 3.200000e+01 : f32
    %327 = vector.broadcast %cst_84 : f32 to vector<16x1xf32>
    %328 = arith.divf %326, %327 : vector<16x1xf32>
    %329 = vector.broadcast %328 : vector<16x1xf32> to vector<16x32xf32>
    %330 = arith.subf %319, %329 : vector<16x32xf32>
    %331 = arith.mulf %330, %330 : vector<16x32xf32>
    %cst_85 = arith.constant dense<0.000000e+00> : vector<16xf32>
    %332 = vector.multi_reduction <add>, %331, %cst_85 [1] : vector<16x32xf32> to vector<16xf32>
    %333 = vector.shape_cast %332 : vector<16xf32> to vector<16x1xf32>
    %cst_86 = arith.constant 3.200000e+01 : f32
    %334 = vector.broadcast %cst_86 : f32 to vector<16x1xf32>
    %335 = arith.divf %333, %334 : vector<16x1xf32>
    %336 = vector.broadcast %328 : vector<16x1xf32> to vector<16x32xf32>
    %337 = arith.subf %319, %336 : vector<16x32xf32>
    %cst_87 = arith.constant 9.99999974E-6 : f32
    %338 = vector.broadcast %cst_87 : f32 to vector<16x1xf32>
    %339 = arith.addf %335, %338 : vector<16x1xf32>
    %340 = math.rsqrt %339 : vector<16x1xf32>
    %341 = vector.broadcast %340 : vector<16x1xf32> to vector<16x32xf32>
    %342 = arith.mulf %337, %341 : vector<16x32xf32>
    %343 = vector.broadcast %323 : vector<1x32xf32> to vector<16x32xf32>
    %344 = arith.mulf %342, %343 : vector<16x32xf32>
    %345 = vector.broadcast %324 : vector<1x32xf32> to vector<16x32xf32>
    %346 = arith.addf %344, %345 : vector<16x32xf32>
    %c0_88 = arith.constant 0 : index
    %c0_89 = arith.constant 0 : index
    %347 = vector.load %arg7[%c0_88, %c0_89] : memref<16x32xf32, #tpu.memory_space<vmem>>, vector<16x32xf32>
    tpu.vector_store %arg7[%c0_88, %c0_89], %346 {strides = array<i32>} : memref<16x32xf32, #tpu.memory_space<vmem>>, vector<16x32xf32>,
    return
  }
}

</mosaic_0001>

<bundles_post_ra>
// kernel: vit_forward.1
= control target key start
LH: loop header
LB: loop body
LE: loop exit
PB: predicated region body
PF: predicated region fallthrough
CT: control target
= control target key end

     0   :  { %vm87_vm0 = vcmask 1045504   ;;  %vm242_vm1 = vcmask 261120   ;;  %v2675_v48 = vmov 0.0   ;;  %vm2676_vm2 = vmmov 0   ;;  %s2677_s9 = smov 112   ;;  %s2678_s10 = smov 120   ;;  %s3269_s2 = inlined_call_operand.vmem [shape: bf16[256,32], index: 2, kind: input, shape index: {}]   ;;  %s3270_s0 = inlined_call_operand.vmem [shape: f32[16,256], index: 0, kind: input, shape index: {}]   ;;  %s3271_s1 = inlined_call_operand.vmem [shape: f32[10,32], index: 1, kind: input, shape index: {}]   ;;  %s3272_s4 = inlined_call_operand.vmem [shape: bf16[2,32,96], index: 4, kind: input, shape index: {}]   ;;  %s3273_s3 = inlined_call_operand.vmem [shape: f32[2,8,64], index: 3, kind: input, shape index: {}]   ;;  %s3274_s6 = inlined_call_operand.vmem [shape: bf16[2,96,32], index: 6, kind: input, shape index: {}]   ;;  %s3275_s5 = inlined_call_operand.vmem [shape: bf16[2,32,64], index: 5, kind: input, shape index: {}]   ;;  %s3276_s8 = inlined_call_operand.vmem [shape: f32[2,16,32], index: 8, kind: output, shape index: {1}]   ;;  %s3277_s7 = inlined_call_operand.vmem [shape: f32[16,32], index: 7, kind: output, shape index: {0}]  }
   0x1   :  { %v2546_v0 = vld [vmem:[%s3269_s2 + $0x40] sm:$0xff]   ;;  %v2548_v2 = vld [vmem:[%s3269_s2 + $0x48] sm:$0xff]   ;;  %v2550_v4 = vld [vmem:[%s3269_s2 + $0x50] sm:$0xff]   ;;  %2307 = vmatprep.subr.bf16.mxu1 %v2675_v48  ;;  %2311 = vmatprep.mubr.msk.bf16.mxu1 %vm2676_vm2, %v2675_v48  ;;  %v31_v53 = vlaneseq  ;;  %s2679_s11 = smov 104   ;;  %s2680_s12 = smov 96   ;;  %vm370_vm3 = vcmask 64512  }
   0x2   :  { %v2547_v1 = vld [vmem:[%s3269_s2] sm:$0xff]   ;;  %2225 = vmatprep.subr.bf16.mxu0 %v2546_v0  ;;  %v2549_v3 = vld [vmem:[%s3269_s2 + $0x8] sm:$0xff]   ;;  %v2551_v5 = vld [vmem:[%s3269_s2 + $0x10] sm:$0xff]   ;;  %vm584_vm9 = vcmask 130048   ;;  %s2682_s13 = smov 64   ;;  %s2683_s18 = smov 8  }
   0x3   :  { %2226 = vmatpush3.bf16.msra.mxu0 %v2547_v1  ;;  %v2552_v6 = vld [vmem:[%s3269_s2 + $0x58] sm:$0xff]   ;;  %v2554_v8 = vld [vmem:[%s3269_s2 + $0x60] sm:$0xff]   ;;  %v2556_v10 = vld [vmem:[%s3269_s2 + $0x68] sm:$0xff]   ;;  %v2824_v57 = vshrl.u32 %v31_v53, 7  ;;  %s2684_s19 = smov 16   ;;  %s2685_s20 = smov 24  }
   0x4   :  { %2227 = vmatprep.subr.bf16.mxu0 %v2548_v2  ;;  %v2553_v7 = vld [vmem:[%s3269_s2 + $0x18] sm:$0xff]   ;;  %v2555_v9 = vld [vmem:[%s3269_s2 + $0x20] sm:$0xff]   ;;  %v48_v11 = vld [vmem:[%s3270_s0 + $0x8] sm:$0xff]  ;;  %vm893_vm10 = vcmask 195584   ;;  %vm1107_vm11 = vcmask 523264  }
   0x5   :  { %v50_v12 = vld [vmem:[%s3270_s0 + $0x18] sm:$0xff]  ;;  %v2557_v14 = vld [vmem:[%s3269_s2 + $0x28] sm:$0xff]   ;;  %v2558_v15 = vld [vmem:[%s3269_s2 + $0x70] sm:$0xff]   ;;  %v2827_v58 = vsub.s32 0, %v2824_v57  ;;  %v2835_v61 = vsub.s32 1, %v2824_v57 }
   0x6   :  { %v84_v13 = vpack.c.bf16 %v50_v12, %v48_v11  ;;  %v2559_v16 = vld [vmem:[%s3269_s2 + $0x30] sm:$0xff]   ;;  %v2560_v17 = vld [vmem:[%s3269_s2 + $0x78] sm:$0xff]   ;;  %v47_v19 = vld [vmem:[%s3270_s0] sm:$0xff] }
   0x7   :  { %2228 = vmatpush3.bf16.msra.mxu0 %v2549_v3  ;;  %v2561_v18 = vld [vmem:[%s3269_s2 + $0x38] sm:$0xff]   ;;  %v49_v20 = vld [vmem:[%s3270_s0 + $0x10] sm:$0xff]  ;;  %v29_v22 = vld [vmem:[%s3271_s1] sm:$0xff] }
   0x8   :  { %2229 = vmatprep.subr.bf16.mxu0 %v2550_v4  ;;  %220 = vmatprep.mubr.bf16.mxu0 %v84_v13  ;;  %v83_v21 = vpack.c.bf16 %v49_v20, %v47_v19  ;;  %v30_v23 = vld [vmem:[%s3271_s1 + $0x8] sm:$0x3]  ;;  %v88_v24 = vrot.slane %v29_v22, 2  ;;  %v2562_v47 = vld [vmem:[%s3272_s4] sm:$0xff]  }
   0x9   :  { %v89_v25 = vrot.slane %v30_v23, 2  ;;  %v2563_v49 = vld [vmem:[%s3272_s4 + $0x8] sm:$0xff]   ;;  %2308 = vmatpush3.bf16.msra.mxu1 %v2562_v47  ;;  %v2832_v59 = vld [vmem:[%s3273_s3] sm:$0xff] }
   0xa   :  { %2309 = vmatprep.subr.bf16.mxu1 %v2675_v48  ;;  %v273_v63 = vrot.slane %v2832_v59, %v2827_v58  ;;  %v279_v3 = vrot.slane %v2832_v59, %v2835_v61 }
   0xb   :  { %2230 = vmatpush3.bf16.msra.mxu0 %v2551_v5  ;;  %v90_v27 = vsel %vm87_vm0, %v88_v24, %v89_v25 }
   0xc   :  { %2231 = vmatprep.subr.bf16.mxu0 %v2552_v6 }
   0xd   :  { %2310 = vmatpush3.bf16.msra.mxu1 %v2563_v49 }
   0xe   :  { %2315 = vmatprep.subr.bf16.mxu1 %v2675_v48 }
   0xf   :  { %2232 = vmatpush3.bf16.msra.mxu0 %v2553_v7 }
  0x10   :  { %2233 = vmatprep.subr.bf16.mxu0 %v2554_v8 }
  0x13   :  { %2234 = vmatpush3.bf16.msra.mxu0 %v2555_v9 }
  0x14   :  { %2235 = vmatprep.subr.bf16.mxu0 %v2556_v10 }
  0x17   :  { %2236 = vmatpush3.bf16.msra.mxu0 %v2557_v14 }
  0x18   :  { %2237 = vmatprep.subr.bf16.mxu0 %v2558_v15 }
  0x1b   :  { %2238 = vmatpush3.bf16.msra.mxu0 %v2559_v16 }
  0x1c   :  { %2239 = vmatprep.subr.bf16.mxu0 %v2560_v17 }
  0x1f   :  { %2240 = vmatpush3.bf16.msra.mxu0 %v2561_v18 }
  0x20   :  { %2345 = vmatprep.subr.bf16.mxu0 %v2675_v48 }
  0x22   :  { %221 = vmatmul.mubr.bf16.vlgmr.msra.gmra.mrb[0].mxu0 %v83_v21 }
  0x23   :  { %2347 = vmatprep.mubr.msk.bf16.mxu0 %vm2676_vm2, %v2675_v48 }
  0xf5   :  { %v2241_v26 = vpop.f32.mrb[0].mxu0 }
  0xf6   :  { %v2242_v28 = vpop.f32.mrb[1].mxu0 }
  0xf7   :  { %v2243_v29 = vadd.f32 %v2242_v28, %v2241_v26  ;;  %v2244_v30 = vpop.f32.mrb[2].mxu0 }
  0xf8   :  { %v2245_v31 = vpop.f32.mrb[3].mxu0 }
  0xf9   :  { %v2797_v32 = vadd.f32 %v2243_v29, %v90_v27  ;;  %v2246_v33 = vadd.f32 %v2245_v31, %v2244_v30 }
  0xfb   :  { %v2799_v34 = vadd.f32 %v2246_v33, %v90_v27  ;;  %v243_v35 = vsel %vm242_vm1, %v2797_v32, 0.0 }
  0xfc   :  { %244 = vadd.xlane.f32.xlu0 %v243_v35 }
  0xfd   :  { %v246_v36 = vsel %vm242_vm1, %v2799_v34, 0.0 }
 0x100   :  { %247 = vadd.xlane.f32.xlu0 %v246_v36  ;;  %v35_v36 = vand.u32 127, %v31_v53 }
 0x189   :  { %v245_v37 = vpop.xlane.xlu0 %244 }
 0x18a   :  { %v250_v38 = vmul.f32 0.03125, %v245_v37  ;;  %v33_v37 = vadd.s32 8, %v2824_v57 }
 0x18c   :  { %v252_v39 = vsub.f32 %v2797_v32, %v250_v38  ;;  %v36_v38 = vshra.s32 %v2824_v57, 3 }
 0x18d   :  { %v248_v40 = vpop.xlane.xlu0 %247 }
 0x18e   :  { %v251_v41 = vmul.f32 0.03125, %v248_v40  ;;  %v254_v42 = vmul.f32 %v252_v39, %v252_v39  ;;  %v41_v40 = vand.u32 7, %v35_v36 }
 0x190   :  { %v253_v43 = vsub.f32 %v2799_v34, %v251_v41  ;;  %v256_v44 = vsel %vm242_vm1, %v254_v42, 0.0  ;;  %v37_v41 = vshra.s32 %v33_v37, 3  ;;  %vm42_vm5 = vcmp.lt.s32.totalorder %v41_v40, 5 }
 0x191   :  { %257 = vadd.xlane.f32.xlu1 %v256_v44 }
 0x192   :  { %v255_v45 = vmul.f32 %v253_v43, %v253_v43 }
 0x194   :  { %v259_v46 = vsel %vm242_vm1, %v255_v45, 0.0 }
 0x195   :  { %260 = vadd.xlane.f32.xlu1 %v259_v46 }
 0x21e   :  { %v258_v50 = vpop.xlane.xlu1 %257 }
 0x21f   :  { %v262_v51 = vmul.f32 0.03125, %v258_v50 }
 0x221   :  { %v264_v52 = vadd.f32 1e-05, %v262_v51 }
 0x222   :  { %v261_v54 = vpop.xlane.xlu1 %260 }
 0x223   :  { %2582 = vrsqrt.f32 %v264_v52  ;;  %v263_v55 = vmul.f32 0.03125, %v261_v54 }
 0x225   :  { %v265_v56 = vadd.f32 1e-05, %v263_v55 }
 0x227   :  { %2584 = vrsqrt.f32 %v265_v56 }
 0x22d   :  { %v2583_v60 = vpop.eup %2582 }
 0x22e   :  { %v268_v62 = vmul.f32 %v2583_v60, %v252_v39  ;;  %v38_v39 = vshra.s32 %v35_v36, 3 }
 0x230   :  { %v274_v2 = vmul.f32 %v273_v63, %v268_v62  ;;  %vm39_vm4 = vcmp.eq.s32.totalorder %v36_v38, %v38_v39  ;;  %vm40_vm6 = vcmp.eq.s32.totalorder %v37_v41, %v38_v39 }
 0x231   :  { %v2585_v0 = vpop.eup %2584  ;;  %vm43_vm7 = vmand %vm39_vm4, %vm42_vm5 }
 0x232   :  { %v269_v1 = vmul.f32 %v2585_v0, %v253_v43  ;;  %v280_v5 = vadd.f32 %v279_v3, %v274_v2  ;;  %vm44_vm8 = vmand %vm40_vm6, %vm42_vm5  ;;  %v2681_v43 = vmov -1e+30  }
 0x233   :  { %v2890_v44 = vsel %vm43_vm7, 0.0, %v2681_v43  ;;  %v2892_v49 = vsel %vm44_vm8, 0.0, %v2681_v43 }
 0x234   :  { %v275_v4 = vmul.f32 %v273_v63, %v269_v1 }
 0x236   :  { %v281_v6 = vadd.f32 %v279_v3, %v275_v4 }
 0x238   :  { %v286_v7 = vpack.c.bf16 %v281_v6, %v280_v5 }
 0x23a   :  { %2312 = vmatmul.mubr.msk.bf16.vlgmr.msra.gmra.mrb[0].mxu1 %vm242_vm1, %v286_v7 }
 0x23b   :  { %2317 = vmatprep.mubr.msk.bf16.mxu1 %vm2676_vm2, %v2675_v48 }
 0x30d   :  { %v336_v8 = vpop.f32.mrb[0].mxu1 }
 0x30e   :  { %v2313_v9 = vpop.f32.mrb[1].mxu1 }
 0x30f   :  { %v339_v10 = vpop.f32.mrb[2].mxu1 }
 0x310   :  { %v2314_v11 = vpop.f32.mrb[3].mxu1  ;;  %v2491_v12 = vpack.i.bf16 %v339_v10, %v336_v8  ;;  %v2844_v13 = vpack.c.bf16 %v339_v10, %v336_v8 }
 0x312   :  { %2492 = vrot.lane.b32.xlu1 %v2491_v12, %s2677_s9  ;;  %2487 = vrot.lane.b32.xlu0 %v2491_v12, %s2678_s10 }
 0x316   :  { %2497 = vrot.lane.b32.xlu1 %v2491_v12, %s2679_s11 }
 0x31a   :  { %368 = vrot.lane.b32.xlu1 %v2844_v13, %s2680_s12 }
 0x384   :  { %v2493_v14 = vpop.permute.xlu1 %2492  ;;  %v2488_v15 = vpop.permute.xlu0 %2487 }
 0x385   :  { %v2495_v16 = vunpack.i.h.bf16 %v2493_v14  ;;  %v2494_v17 = vunpack.i.l.bf16 %v2493_v14  ;;  %v2490_v18 = vunpack.i.h.bf16 %v2488_v15  ;;  %v2489_v19 = vunpack.i.l.bf16 %v2488_v15 }
 0x387   :  { %v2851_v20 = vpack.c.bf16 %v2495_v16, %v2494_v17  ;;  %v2853_v21 = vpack.c.bf16 %v2490_v18, %v2489_v19 }
 0x388   :  { %v2498_v22 = vpop.permute.xlu1 %2497 }
 0x389   :  { %v2500_v23 = vunpack.i.h.bf16 %v2498_v22  ;;  %v2499_v24 = vunpack.i.l.bf16 %v2498_v22  ;;  %419 = vrot.lane.b32.xlu0 %v2853_v21, %s2680_s12  ;;  %469 = vrot.lane.b32.xlu1 %v2851_v20, %s2680_s12 }
 0x38b   :  { %v2859_v25 = vpack.c.bf16 %v2500_v23, %v2499_v24 }
 0x38c   :  { %v369_v26 = vpop.permute.xlu1 %368 }
 0x38d   :  { %v375_v27 = vsel %vm370_vm3, %v369_v26, 0  ;;  %519 = vrot.lane.b32.xlu0 %v2859_v25, %s2680_s12 }
 0x38e   :  { %2316 = vmatpush3.bf16.xpose.msra.mxu1 %v375_v27 }
 0x38f   :  { %2321 = vmatprep.subr.bf16.mxu1 %v2675_v48 }
 0x395   :  { %2318 = vmatmul.mubr.msk.bf16.vlgmr.msra.gmra.mrb[4].mxu1 %vm370_vm3, %v2844_v13 }
 0x396   :  { %2323 = vmatprep.mubr.msk.bf16.mxu1 %vm2676_vm2, %v2675_v48 }
 0x3fb   :  { %v420_v28 = vpop.permute.xlu0 %419  ;;  %v470_v30 = vpop.permute.xlu1 %469 }
 0x3fc   :  { %v425_v29 = vsel %vm370_vm3, %v420_v28, 0  ;;  %v475_v31 = vsel %vm370_vm3, %v470_v30, 0 }
 0x3fd   :  { %2322 = vmatpush3.bf16.xpose.msra.mxu1 %v425_v29 }
 0x3fe   :  { %2327 = vmatprep.subr.bf16.mxu1 %v2675_v48 }
 0x3ff   :  { %v520_v33 = vpop.permute.xlu0 %519 }
 0x400   :  { %v525_v35 = vsel %vm370_vm3, %v520_v33, 0 }
 0x404   :  { %2324 = vmatmul.mubr.msk.bf16.vlgmr.msra.gmra.mrb[8].mxu1 %vm370_vm3, %v2853_v21 }
 0x405   :  { %2328 = vmatpush3.bf16.xpose.msra.mxu1 %v475_v31  ;;  %2329 = vmatprep.mubr.msk.bf16.mxu1 %vm2676_vm2, %v2675_v48 }
 0x406   :  { %2333 = vmatprep.subr.bf16.mxu1 %v2675_v48 }
 0x40c   :  { %2330 = vmatmul.mubr.msk.bf16.vlgmr.msra.gmra.mrb[12].mxu1 %vm370_vm3, %v2851_v20 }
 0x40d   :  { %2334 = vmatpush3.bf16.xpose.msra.mxu1 %v525_v35  ;;  %2335 = vmatprep.mubr.msk.bf16.mxu1 %vm2676_vm2, %v2675_v48 }
 0x40e   :  { %2339 = vmatprep.subr.bf16.mxu1 %v2675_v48 }
 0x414   :  { %2336 = vmatmul.mubr.msk.bf16.vlgmr.msra.gmra.mrb[16].mxu1 %vm370_vm3, %v2859_v25 }
 0x415   :  { %2341 = vmatprep.mubr.msk.bf16.mxu1 %vm2676_vm2, %v2675_v48 }
 0x468   :  { %v411_v42 = vpop.f32.mrb[4].mxu1 }
 0x469   :  { %v568_v45 = vmul.f32 0.35355338, %v411_v42  ;;  %v2319_v46 = vpop.f32.mrb[5].mxu1 }
 0x46a   :  { %v414_v47 = vpop.f32.mrb[6].mxu1 }
 0x46b   :  { %v569_v50 = vmul.f32 0.35355338, %v414_v47  ;;  %v2320_v51 = vpop.f32.mrb[7].mxu1  ;;  %v576_v52 = vadd.f32 %v568_v45, %v2890_v44 }
 0x46d   :  { %v585_v53 = vsel %vm584_vm9, %v576_v52, -inf  ;;  %v577_v54 = vadd.f32 %v569_v50, %v2892_v49 }
 0x46e   :  { %586 = vmax.xlane.f32.xlu1 %v585_v53 }
 0x46f   :  { %v588_v55 = vsel %vm584_vm9, %v577_v54, -inf }
 0x470   :  { %589 = vmax.xlane.f32.xlu0 %v588_v55 }
 0x4d7   :  { %v461_v56 = vpop.f32.mrb[8].mxu1 }
 0x4d8   :  { %v570_v60 = vmul.f32 0.35355338, %v461_v56  ;;  %v2325_v62 = vpop.f32.mrb[9].mxu1 }
 0x4d9   :  { %v464_v63 = vpop.f32.mrb[10].mxu1 }
 0x4da   :  { %v571_v0 = vmul.f32 0.35355338, %v464_v63  ;;  %v2326_v1 = vpop.f32.mrb[11].mxu1  ;;  %v578_v2 = vadd.f32 %v570_v60, %v2890_v44 }
 0x4dc   :  { %v591_v3 = vsel %vm584_vm9, %v578_v2, -inf  ;;  %v579_v4 = vadd.f32 %v571_v0, %v2892_v49 }
 0x4dd   :  { %592 = vmax.xlane.f32.xlu0 %v591_v3 }
 0x4de   :  { %v594_v8 = vsel %vm584_vm9, %v579_v4, -inf }
 0x4df   :  { %v511_v5 = vpop.f32.mrb[12].mxu1 }
 0x4e0   :  { %v572_v6 = vmul.f32 0.35355338, %v511_v5  ;;  %v2331_v7 = vpop.f32.mrb[13].mxu1 }
 0x4e1   :  { %595 = vmax.xlane.f32.xlu0 %v594_v8  ;;  %v514_v9 = vpop.f32.mrb[14].mxu1 }
 0x4e2   :  { %v573_v10 = vmul.f32 0.35355338, %v514_v9  ;;  %v2332_v11 = vpop.f32.mrb[15].mxu1  ;;  %v580_v12 = vadd.f32 %v572_v6, %v2890_v44 }
 0x4e4   :  { %v597_v14 = vsel %vm584_vm9, %v580_v12, -inf  ;;  %v581_v15 = vadd.f32 %v573_v10, %v2892_v49 }
 0x4e5   :  { %598 = vmax.xlane.f32.xlu1 %v597_v14 }
 0x4e6   :  { %v600_v16 = vsel %vm584_vm9, %v581_v15, -inf }
 0x4e7   :  { %601 = vmax.xlane.f32.xlu0 %v600_v16  ;;  %v561_v17 = vpop.f32.mrb[16].mxu1 }
 0x4e8   :  { %v574_v18 = vmul.f32 0.35355338, %v561_v17  ;;  %v2337_v19 = vpop.f32.mrb[17].mxu1 }
 0x4e9   :  { %v564_v22 = vpop.f32.mrb[18].mxu1 }
 0x4ea   :  { %v575_v23 = vmul.f32 0.35355338, %v564_v22  ;;  %v2338_v24 = vpop.f32.mrb[19].mxu1  ;;  %v582_v26 = vadd.f32 %v574_v18, %v2890_v44 }
 0x4ec   :  { %v603_v27 = vsel %vm584_vm9, %v582_v26, -inf  ;;  %v583_v28 = vadd.f32 %v575_v23, %v2892_v49 }
 0x4ed   :  { %604 = vmax.xlane.f32.xlu1 %v603_v27 }
 0x4ee   :  { %v606_v29 = vsel %vm584_vm9, %v583_v28, -inf }
 0x4ef   :  { %607 = vmax.xlane.f32.xlu0 %v606_v29 }
 0x4fb   :  { %v587_v35 = vpop.xlane.xlu1 %586 }
 0x4fc   :  { %v609_v37 = vsub.f32 %v576_v52, %v587_v35 }
 0x4fd   :  { %v590_v30 = vpop.xlane.xlu0 %589 }
 0x4fe   :  { %v610_v31 = vsub.f32 %v577_v54, %v590_v30  ;;  %677 = vrot.lane.b32.xlu1 %v2844_v13, %s2682_s13  ;;  %v617_v39 = vmul.f32 1.442695, %v609_v37 }
 0x500   :  { %v619_v33 = vmul.f32 1.442695, %v610_v31 }
 0x502   :  { %2586 = vpow2.f32 %v619_v33 }
 0x503   :  { %2588 = vpow2.f32 %v617_v39 }
 0x50c   :  { %v2912_v36 = vpop.eup %2586 }
 0x50d   :  { %v636_v38 = vsel %vm584_vm9, %v2912_v36, 0.0  ;;  %v2589_v40 = vpop.eup %2588 }
 0x50e   :  { %637 = vadd.xlane.f32.xlu0 %v636_v38  ;;  %v633_v41 = vsel %vm584_vm9, %v2589_v40, 0.0 }
 0x522   :  { %634 = vadd.xlane.f32.xlu1 %v633_v41 }
 0x56a   :  { %v593_v42 = vpop.xlane.xlu0 %592 }
 0x56b   :  { %v611_v43 = vsub.f32 %v578_v2, %v593_v42 }
 0x56d   :  { %v621_v45 = vmul.f32 1.442695, %v611_v43 }
 0x56e   :  { %v596_v13 = vpop.xlane.xlu0 %595 }
 0x56f   :  { %2590 = vpow2.f32 %v621_v45  ;;  %v612_v46 = vsub.f32 %v579_v4, %v596_v13 }
 0x571   :  { %v623_v47 = vmul.f32 1.442695, %v612_v46 }
 0x572   :  { %v599_v50 = vpop.xlane.xlu1 %598 }
 0x573   :  { %2592 = vpow2.f32 %v623_v47  ;;  %v613_v51 = vsub.f32 %v580_v12, %v599_v50 }
 0x574   :  { %v602_v52 = vpop.xlane.xlu0 %601 }
 0x575   :  { %v625_v53 = vmul.f32 1.442695, %v613_v51  ;;  %v614_v54 = vsub.f32 %v581_v15, %v602_v52 }
 0x577   :  { %2594 = vpow2.f32 %v625_v53  ;;  %v627_v55 = vmul.f32 1.442695, %v614_v54 }
 0x579   :  { %v2917_v56 = vpop.eup %2590  ;;  %2596 = vpow2.f32 %v627_v55  ;;  %v2564_v55 = vld [vmem:[%s3274_s6] sm:$0xff]  }
 0x57a   :  { %v605_v60 = vpop.xlane.xlu1 %604  ;;  %v639_v62 = vsel %vm584_vm9, %v2917_v56, 0.0 }
 0x57b   :  { %v615_v63 = vsub.f32 %v582_v26, %v605_v60  ;;  %640 = vadd.xlane.f32.xlu1 %v639_v62  ;;  %v2565_v62 = vld [vmem:[%s3274_s6 + $0x8] sm:$0xff]  }
 0x57c   :  { %v608_v0 = vpop.xlane.xlu0 %607 }
 0x57d   :  { %v2593_v1 = vpop.eup %2592  ;;  %v629_v2 = vmul.f32 1.442695, %v615_v63  ;;  %v616_v3 = vsub.f32 %v583_v28, %v608_v0 }
 0x57e   :  { %v678_v4 = vpop.permute.xlu1 %677  ;;  %v642_v5 = vsel %vm584_vm9, %v2593_v1, 0.0 }
 0x57f   :  { %2598 = vpow2.f32 %v629_v2  ;;  %v631_v6 = vmul.f32 1.442695, %v616_v3  ;;  %2340 = vmatpush3.bf16.msra.mxu1 %v678_v4  ;;  %643 = vadd.xlane.f32.xlu0 %v642_v5 }
 0x580   :  { %2351 = vmatprep.subr.bf16.mxu1 %v2675_v48 }
 0x581   :  { %v2595_v7 = vpop.eup %2594  ;;  %2600 = vpow2.f32 %v631_v6 }
 0x582   :  { %v645_v8 = vsel %vm584_vm9, %v2595_v7, 0.0 }
 0x583   :  { %v2597_v9 = vpop.eup %2596  ;;  %646 = vadd.xlane.f32.xlu1 %v645_v8 }
 0x584   :  { %v648_v10 = vsel %vm584_vm9, %v2597_v9, 0.0 }
 0x585   :  { %649 = vadd.xlane.f32.xlu0 %v648_v10 }
 0x589   :  { %v2599_v11 = vpop.eup %2598 }
 0x58a   :  { %v651_v12 = vsel %vm584_vm9, %v2599_v11, 0.0 }
 0x58b   :  { %v2601_v14 = vpop.eup %2600  ;;  %652 = vadd.xlane.f32.xlu1 %v651_v12 }
 0x58c   :  { %v654_v15 = vsel %vm584_vm9, %v2601_v14, 0.0 }
 0x58d   :  { %655 = vadd.xlane.f32.xlu0 %v654_v15 }
 0x59b   :  { %v638_v16 = vpop.xlane.xlu0 %637 }
 0x59c   :  { %771 = vrot.lane.b32.xlu1 %v2851_v20, %s2682_s13  ;;  %2602 = vrcp.f32 %v638_v16 }
 0x5a0   :  { %818 = vrot.lane.b32.xlu1 %v2859_v25, %s2682_s13 }
 0x5a3   :  { %724 = vrot.lane.b32.xlu0 %v2853_v21, %s2682_s13 }
 0x5a6   :  { %v2603_v18 = vpop.eup %2602 }
 0x5a7   :  { %v666_v22 = vmul.f32 %v2603_v18, %v2912_v36 }
 0x5af   :  { %v635_v17 = vpop.xlane.xlu1 %634 }
 0x5b0   :  { %2604 = vrcp.f32 %v635_v17 }
 0x5ba   :  { %v2605_v19 = vpop.eup %2604 }
 0x5bb   :  { %v665_v23 = vmul.f32 %v2605_v19, %v2589_v40 }
 0x5bd   :  { %v673_v24 = vpack.c.bf16 %v666_v22, %v665_v23 }
 0x5bf   :  { %2342 = vmatmul.mubr.msk.bf16.vlgmr.msra.gmra.mrb[20].mxu1 %vm584_vm9, %v673_v24 }
 0x5c0   :  { %2353 = vmatprep.mubr.msk.bf16.mxu1 %vm2676_vm2, %v2675_v48 }
 0x608   :  { %v641_v20 = vpop.xlane.xlu1 %640 }
 0x60c   :  { %v644_v25 = vpop.xlane.xlu0 %643 }
 0x60d   :  { %2606 = vrcp.f32 %v644_v25 }
 0x60e   :  { %2608 = vrcp.f32 %v641_v20 }
 0x610   :  { %v647_v21 = vpop.xlane.xlu1 %646 }
 0x611   :  { %2610 = vrcp.f32 %v647_v21 }
 0x612   :  { %v650_v26 = vpop.xlane.xlu0 %649 }
 0x613   :  { %2612 = vrcp.f32 %v650_v26 }
 0x617   :  { %v2607_v28 = vpop.eup %2606 }
 0x618   :  { %v653_v27 = vpop.xlane.xlu1 %652  ;;  %v2609_v29 = vpop.eup %2608  ;;  %v668_v33 = vmul.f32 %v2607_v28, %v2593_v1 }
 0x619   :  { %2614 = vrcp.f32 %v653_v27  ;;  %v667_v37 = vmul.f32 %v2609_v29, %v2917_v56  ;;  %v957_v29 = vsub.s32 2, %v2824_v57 }
 0x61a   :  { %v656_v30 = vpop.xlane.xlu0 %655 }
 0x61b   :  { %v2611_v31 = vpop.eup %2610  ;;  %2616 = vrcp.f32 %v656_v30  ;;  %v674_v41 = vpack.c.bf16 %v668_v33, %v667_v37  ;;  %v958_v30 = vrot.slane %v2832_v59, %v957_v29 }
 0x61c   :  { %v772_v35 = vpop.permute.xlu1 %771  ;;  %v669_v38 = vmul.f32 %v2611_v31, %v2595_v7 }
 0x61d   :  { %v2613_v36 = vpop.eup %2612  ;;  %2352 = vmatpush3.bf16.msra.mxu1 %v772_v35 }
 0x61e   :  { %v670_v39 = vmul.f32 %v2613_v36, %v2597_v9  ;;  %v725_v40 = vpop.permute.xlu0 %724  ;;  %2363 = vmatprep.subr.bf16.mxu1 %v2675_v48 }
 0x61f   :  { %2346 = vmatpush3.bf16.msra.mxu0 %v725_v40 }
 0x620   :  { %v675_v42 = vpack.c.bf16 %v670_v39, %v669_v38  ;;  %2357 = vmatprep.subr.bf16.mxu0 %v2675_v48  ;;  %v819_v43 = vpop.permute.xlu1 %818 }
 0x622   :  { %2348 = vmatmul.mubr.msk.bf16.vlgmr.msra.gmra.mrb[4].mxu0 %vm584_vm9, %v674_v41  ;;  %2354 = vmatmul.mubr.msk.bf16.vlgmr.msra.gmra.mrb[24].mxu1 %vm584_vm9, %v675_v42 }
 0x623   :  { %v2615_v45 = vpop.eup %2614  ;;  %2358 = vmatpush3.bf16.msra.mxu0 %v819_v43  ;;  %2359 = vmatprep.mubr.msk.bf16.mxu0 %vm2676_vm2, %v2675_v48 }
 0x624   :  { %2367 = vmatprep.mubr.msk.bf16.mxu1 %vm2676_vm2, %v2675_v48  ;;  %2371 = vmatprep.subr.bf16.mxu0 %v2675_v48  ;;  %v671_v46 = vmul.f32 %v2615_v45, %v2599_v11 }
 0x625   :  { %v2617_v13 = vpop.eup %2616  ;;  %2364 = vmatpush3.bf16.msra.mxu1 %v2564_v55 }
 0x626   :  { %v672_v47 = vmul.f32 %v2617_v13, %v2601_v14  ;;  %2365 = vmatprep.subr.bf16.mxu1 %v2675_v48 }
 0x628   :  { %v676_v50 = vpack.c.bf16 %v672_v47, %v671_v46 }
 0x629   :  { %2366 = vmatpush3.bf16.msra.mxu1 %v2565_v62 }
 0x62a   :  { %2360 = vmatmul.mubr.msk.bf16.vlgmr.msra.gmra.mrb[8].mxu0 %vm584_vm9, %v676_v50  ;;  %2379 = vmatprep.subr.bf16.mxu1 %v2675_v48 }
 0x62b   :  { %2375 = vmatprep.mubr.msk.bf16.mxu0 %vm2676_vm2, %v2675_v48 }
 0x692   :  { %v717_v51 = vpop.f32.mrb[20].mxu1 }
 0x693   :  { %v2343_v52 = vpop.f32.mrb[21].mxu1 }
 0x694   :  { %v720_v53 = vpop.f32.mrb[22].mxu1 }
 0x695   :  { %v2344_v54 = vpop.f32.mrb[23].mxu1 }
 0x696   :  { %v2567_v54 = vld [vmem:[%s3275_s5 + $0x8] sm:$0xff]  }
 0x6f5   :  { %v764_v56 = vpop.f32.mrb[4].mxu0  ;;  %v811_v60 = vpop.f32.mrb[24].mxu1 }
 0x6f6   :  { %v2349_v63 = vpop.f32.mrb[5].mxu0  ;;  %v2355_v0 = vpop.f32.mrb[25].mxu1 }
 0x6f7   :  { %v767_v1 = vpop.f32.mrb[6].mxu0  ;;  %v814_v2 = vpop.f32.mrb[26].mxu1 }
 0x6f8   :  { %v2501_v3 = vpack.i.bf16 %v767_v1, %v764_v56  ;;  %v2506_v4 = vpack.i.bf16 %v814_v2, %v811_v60  ;;  %v2350_v5 = vpop.f32.mrb[7].mxu0  ;;  %v2356_v6 = vpop.f32.mrb[27].mxu1  ;;  %v989_v1 = vsub.s32 3, %v2824_v57 }
 0x6f9   :  { %v995_v5 = vsub.s32 4, %v2824_v57 }
 0x6fa   :  { %2502 = vrot.lane.b32.xlu1 %v2501_v3, %s2683_s18  ;;  %2507 = vrot.lane.b32.xlu0 %v2506_v4, %s2684_s19  ;;  %v990_v3 = vrot.slane %v2832_v59, %v989_v1 }
 0x6fd   :  { %v858_v7 = vpop.f32.mrb[8].mxu0 }
 0x6fe   :  { %v2361_v8 = vpop.f32.mrb[9].mxu0 }
 0x6ff   :  { %v861_v9 = vpop.f32.mrb[10].mxu0 }
 0x700   :  { %v2511_v10 = vpack.i.bf16 %v861_v9, %v858_v7  ;;  %v2362_v11 = vpop.f32.mrb[11].mxu0  ;;  %v996_v9 = vrot.slane %v2832_v59, %v995_v5 }
 0x702   :  { %2512 = vrot.lane.b32.xlu1 %v2511_v10, %s2685_s20 }
 0x76c   :  { %v2503_v12 = vpop.permute.xlu1 %2502  ;;  %v2508_v16 = vpop.permute.xlu0 %2507 }
 0x76d   :  { %v2505_v14 = vunpack.i.h.bf16 %v2503_v12  ;;  %v2504_v15 = vunpack.i.l.bf16 %v2503_v12  ;;  %v2510_v17 = vunpack.i.h.bf16 %v2508_v16  ;;  %v2509_v18 = vunpack.i.l.bf16 %v2508_v16  ;;  %v2569_v16 = vld [vmem:[%s3274_s6 + $0x18] sm:$0xff]  }
 0x76f   :  { %v889_v19 = vsel %vm370_vm3, %v717_v51, %v2504_v15  ;;  %v890_v22 = vsel %vm370_vm3, %v720_v53, %v2505_v14  ;;  %v2566_v53 = vld [vmem:[%s3275_s5] sm:$0xff]   ;;  %v2568_v15 = vld [vmem:[%s3274_s6 + $0x10] sm:$0xff]  }
 0x770   :  { %v892_v25 = vsel %vm584_vm9, %v890_v22, %v2510_v17  ;;  %v891_v21 = vsel %vm584_vm9, %v889_v19, %v2509_v18  ;;  %2372 = vmatpush3.bf16.msra.mxu0 %v2566_v53  ;;  %v2570_v17 = vld [vmem:[%s3274_s6 + $0x20] sm:$0xff]   ;;  %v2571_v18 = vld [vmem:[%s3274_s6 + $0x28] sm:$0xff]   ;;  %v1006_v19 = vsub.s32 6, %v2824_v57 }
 0x771   :  { %2373 = vmatprep.subr.bf16.mxu0 %v2675_v48 }
 0x772   :  { %v1007_v22 = vrot.slane %v2832_v59, %v1006_v19 }
 0x774   :  { %v2513_v23 = vpop.permute.xlu1 %2512  ;;  %2374 = vmatpush3.bf16.msra.mxu0 %v2567_v54 }
 0x775   :  { %v2515_v24 = vunpack.i.h.bf16 %v2513_v23  ;;  %v2514_v20 = vunpack.i.l.bf16 %v2513_v23  ;;  %2391 = vmatprep.subr.bf16.mxu0 %v2675_v48 }
 0x777   :  { %v894_v26 = vsel %vm893_vm10, %v891_v21, %v2514_v20  ;;  %v895_v27 = vsel %vm893_vm10, %v892_v25, %v2515_v24 }
 0x778   :  { %v896_v28 = vpack.c.bf16 %v895_v27, %v894_v26 }
 0x77a   :  { %2368 = vmatmul.mubr.msk.bf16.vlgmr.msra.gmra.mrb[28].mxu1 %vm242_vm1, %v896_v28 }
 0x77b   :  { %2387 = vmatprep.mubr.msk.bf16.mxu1 %vm2676_vm2, %v2675_v48  ;;  %2380 = vmatpush3.bf16.msra.mxu1 %v2568_v15 }
 0x77c   :  { %2381 = vmatprep.subr.bf16.mxu1 %v2675_v48 }
 0x77f   :  { %2382 = vmatpush3.bf16.msra.mxu1 %v2569_v16 }
 0x780   :  { %2383 = vmatprep.subr.bf16.mxu1 %v2675_v48 }
 0x783   :  { %2384 = vmatpush3.bf16.msra.mxu1 %v2570_v17 }
 0x784   :  { %2385 = vmatprep.subr.bf16.mxu1 %v2675_v48 }
 0x787   :  { %2386 = vmatpush3.bf16.msra.mxu1 %v2571_v18 }
 0x788   :  { %2405 = vmatprep.subr.bf16.mxu1 %v2675_v48 }
 0x84d   :  { %v946_v31 = vpop.f32.mrb[28].mxu1 }
 0x84e   :  { %v953_v33 = vadd.f32 %v946_v31, %v2797_v32  ;;  %v2369_v35 = vpop.f32.mrb[29].mxu1 }
 0x84f   :  { %v949_v36 = vpop.f32.mrb[30].mxu1 }
 0x850   :  { %v2975_v37 = vadd.f32 %v958_v30, %v953_v33  ;;  %v954_v38 = vadd.f32 %v949_v36, %v2799_v34  ;;  %v2370_v39 = vpop.f32.mrb[31].mxu1 }
 0x852   :  { %v2978_v40 = vadd.f32 %v958_v30, %v954_v38  ;;  %v961_v41 = vsel %vm242_vm1, %v2975_v37, 0.0 }
 0x853   :  { %962 = vadd.xlane.f32.xlu0 %v961_v41 }
 0x854   :  { %v964_v42 = vsel %vm242_vm1, %v2978_v40, 0.0 }
 0x855   :  { %965 = vadd.xlane.f32.xlu1 %v964_v42 }
 0x8e0   :  { %v963_v43 = vpop.xlane.xlu0 %962 }
 0x8e1   :  { %v967_v45 = vmul.f32 0.03125, %v963_v43 }
 0x8e2   :  { %v966_v32 = vpop.xlane.xlu1 %965 }
 0x8e3   :  { %v969_v13 = vsub.f32 %v2975_v37, %v967_v45  ;;  %v968_v46 = vmul.f32 0.03125, %v966_v32 }
 0x8e5   :  { %v970_v47 = vsub.f32 %v2978_v40, %v968_v46  ;;  %v971_v34 = vmul.f32 %v969_v13, %v969_v13 }
 0x8e7   :  { %v973_v50 = vsel %vm242_vm1, %v971_v34, 0.0  ;;  %v972_v51 = vmul.f32 %v970_v47, %v970_v47 }
 0x8e8   :  { %974 = vadd.xlane.f32.xlu0 %v973_v50 }
 0x8e9   :  { %v976_v52 = vsel %vm242_vm1, %v972_v51, 0.0  ;;  %v1156_v51 = vsub.s32 5, %v2824_v57 }
 0x8ec   :  { %977 = vadd.xlane.f32.xlu0 %v976_v52  ;;  %v1157_v52 = vrot.slane %v2832_v59, %v1156_v51 }
 0x975   :  { %v975_v55 = vpop.xlane.xlu0 %974 }
 0x976   :  { %v979_v56 = vmul.f32 0.03125, %v975_v55 }
 0x978   :  { %v981_v60 = vadd.f32 1e-05, %v979_v56 }
 0x979   :  { %v978_v62 = vpop.xlane.xlu0 %977 }
 0x97a   :  { %2618 = vrsqrt.f32 %v981_v60  ;;  %v980_v63 = vmul.f32 0.03125, %v978_v62 }
 0x97c   :  { %v982_v0 = vadd.f32 1e-05, %v980_v63 }
 0x97e   :  { %2620 = vrsqrt.f32 %v982_v0 }
 0x984   :  { %v2619_v2 = vpop.eup %2618 }
 0x985   :  { %v985_v4 = vmul.f32 %v2619_v2, %v969_v13 }
 0x987   :  { %v991_v7 = vmul.f32 %v990_v3, %v985_v4 }
 0x988   :  { %v2621_v6 = vpop.eup %2620 }
 0x989   :  { %v986_v8 = vmul.f32 %v2621_v6, %v970_v47  ;;  %v997_v11 = vadd.f32 %v996_v9, %v991_v7 }
 0x98b   :  { %v992_v10 = vmul.f32 %v990_v3, %v986_v8 }
 0x98d   :  { %v998_v12 = vadd.f32 %v996_v9, %v992_v10 }
 0x98f   :  { %v1003_v14 = vpack.c.bf16 %v998_v12, %v997_v11  ;;  %v2572_v12 = vld [vmem:[%s3272_s4 + $0x10] sm:$0xff]  }
 0x991   :  { %2376 = vmatmul.mubr.msk.bf16.vlgmr.msra.gmra.mrb[12].mxu0 %vm242_vm1, %v1003_v14  ;;  %v2573_v14 = vld [vmem:[%s3272_s4 + $0x18] sm:$0xff]  }
 0x992   :  { %2395 = vmatprep.mubr.msk.bf16.mxu0 %vm2676_vm2, %v2675_v48  ;;  %2392 = vmatpush3.bf16.msra.mxu0 %v2572_v12 }
 0x993   :  { %2393 = vmatprep.subr.bf16.mxu0 %v2675_v48 }
 0x996   :  { %2394 = vmatpush3.bf16.msra.mxu0 %v2573_v14 }
 0x997   :  { %2399 = vmatprep.subr.bf16.mxu0 %v2675_v48 }
 0xa64   :  { %v1057_v23 = vpop.f32.mrb[12].mxu0 }
 0xa65   :  { %v1058_v24 = vadd.f32 %v1057_v23, %v1007_v22  ;;  %v2377_v20 = vpop.f32.mrb[13].mxu0 }
 0xa66   :  { %v1060_v25 = vpop.f32.mrb[14].mxu0 }
 0xa67   :  { %v1066_v21 = vmul.f32 0.044715, %v1058_v24  ;;  %v1061_v26 = vadd.f32 %v1060_v25, %v1007_v22  ;;  %v2378_v27 = vpop.f32.mrb[15].mxu0  ;;  %v1064_v32 = vmul.f32 0.5, %v1058_v24 }
 0xa69   :  { %v1068_v28 = vmul.f32 %v1066_v21, %v1058_v24  ;;  %v1067_v30 = vmul.f32 0.044715, %v1061_v26  ;;  %v1065_v13 = vmul.f32 0.5, %v1061_v26 }
 0xa6b   :  { %v1070_v31 = vmul.f32 %v1068_v28, %v1058_v24  ;;  %v1069_v33 = vmul.f32 %v1067_v30, %v1061_v26 }
 0xa6d   :  { %v1072_v35 = vadd.f32 %v1070_v31, %v1058_v24  ;;  %v1071_v36 = vmul.f32 %v1069_v33, %v1061_v26  ;;  %v3069_v24 = vld [vmem:[%s3273_s3 + $0x8] sm:$0xff] }
 0xa6e   :  { %v1206_v20 = vrot.slane %v3069_v24, %v2827_v58  ;;  %v1212_v30 = vrot.slane %v3069_v24, %v2835_v61 }
 0xa6f   :  { %v1074_v38 = vmul.f32 0.7978846, %v1072_v35  ;;  %v1073_v39 = vadd.f32 %v1071_v36, %v1061_v26 }
 0xa71   :  { %2622 = vtanh.f32 %v1074_v38  ;;  %v1075_v41 = vmul.f32 0.7978846, %v1073_v39 }
 0xa73   :  { %2624 = vtanh.f32 %v1075_v41 }
 0xa7b   :  { %v2623_v42 = vpop.eup %2622 }
 0xa7c   :  { %v1078_v43 = vadd.f32 1.0, %v2623_v42 }
 0xa7d   :  { %v2625_v45 = vpop.eup %2624 }
 0xa7e   :  { %v1079_v46 = vadd.f32 1.0, %v2625_v45  ;;  %v1080_v47 = vmul.f32 %v1078_v43, %v1064_v32 }
 0xa80   :  { %v1081_v34 = vmul.f32 %v1079_v46, %v1065_v13 }
 0xa82   :  { %v1082_v50 = vpack.c.bf16 %v1081_v34, %v1080_v47 }
 0xa84   :  { %2388 = vmatmul.mubr.msk.bf16.vlgmr.msra.gmra.mrb[32].mxu1 %vm1107_vm11, %v1082_v50 }
 0xa85   :  { %2407 = vmatprep.mubr.msk.bf16.mxu1 %vm2676_vm2, %v2675_v48 }
 0xb57   :  { %v1145_v53 = vpop.f32.mrb[32].mxu1 }
 0xb58   :  { %v1152_v54 = vadd.f32 %v1145_v53, %v2975_v37  ;;  %v2389_v55 = vpop.f32.mrb[33].mxu1 }
 0xb59   :  { %v1148_v56 = vpop.f32.mrb[34].mxu1 }
 0xb5a   :  { %v3035_v60 = vadd.f32 %v1157_v52, %v1152_v54  ;;  %v1153_v62 = vadd.f32 %v1148_v56, %v2978_v40  ;;  %v2390_v63 = vpop.f32.mrb[35].mxu1 }
 0xb5c   :  { %1160 = vst.msk [vmem:[%s3276_s8] sm:$0xff] %vm242_vm1, %v3035_v60  ;;  %v3043_v0 = vadd.f32 %v1157_v52, %v1153_v62  ;;  %v1177_v59 = vsel %vm242_vm1, %v3035_v60, 0.0 }
 0xb5d   :  { %1178 = vadd.xlane.f32.xlu0 %v1177_v59 }
 0xb5e   :  { %1161 = vst.msk [vmem:[%s3276_s8 + $0x8] sm:$0xff] %vm242_vm1, %v3043_v0  ;;  %v1180_v37 = vsel %vm242_vm1, %v3043_v0, 0.0 }
 0xb5f   :  { %1181 = vadd.xlane.f32.xlu1 %v1180_v37 }
 0xbea   :  { %v1179_v40 = vpop.xlane.xlu0 %1178 }
 0xbeb   :  { %v1183_v2 = vmul.f32 0.03125, %v1179_v40 }
 0xbec   :  { %v1182_v3 = vpop.xlane.xlu1 %1181 }
 0xbed   :  { %v1185_v4 = vsub.f32 %v3035_v60, %v1183_v2  ;;  %v1184_v6 = vmul.f32 0.03125, %v1182_v3 }
 0xbef   :  { %v1186_v7 = vsub.f32 %v3043_v0, %v1184_v6  ;;  %v1187_v8 = vmul.f32 %v1185_v4, %v1185_v4 }
 0xbf1   :  { %v1189_v9 = vsel %vm242_vm1, %v1187_v8, 0.0  ;;  %v1188_v10 = vmul.f32 %v1186_v7, %v1186_v7 }
 0xbf2   :  { %1190 = vadd.xlane.f32.xlu0 %v1189_v9 }
 0xbf3   :  { %v1192_v11 = vsel %vm242_vm1, %v1188_v10, 0.0 }
 0xbf4   :  { %1193 = vadd.xlane.f32.xlu1 %v1192_v11 }
 0xc7f   :  { %v1191_v15 = vpop.xlane.xlu0 %1190 }
 0xc80   :  { %v1195_v16 = vmul.f32 0.03125, %v1191_v15 }
 0xc81   :  { %v1194_v17 = vpop.xlane.xlu1 %1193 }
 0xc82   :  { %v1197_v18 = vadd.f32 1e-05, %v1195_v16  ;;  %v1196_v22 = vmul.f32 0.03125, %v1194_v17 }
 0xc84   :  { %2626 = vrsqrt.f32 %v1197_v18  ;;  %v1198_v23 = vadd.f32 1e-05, %v1196_v22 }
 0xc86   :  { %2628 = vrsqrt.f32 %v1198_v23 }
 0xc8e   :  { %v2627_v25 = vpop.eup %2626 }
 0xc8f   :  { %v1201_v21 = vmul.f32 %v2627_v25, %v1185_v4 }
 0xc90   :  { %v2629_v26 = vpop.eup %2628 }
 0xc91   :  { %v1207_v27 = vmul.f32 %v1206_v20, %v1201_v21  ;;  %v1202_v28 = vmul.f32 %v2629_v26, %v1186_v7 }
 0xc93   :  { %v1208_v31 = vmul.f32 %v1206_v20, %v1202_v28  ;;  %v1213_v33 = vadd.f32 %v1212_v30, %v1207_v27 }
 0xc95   :  { %v1214_v35 = vadd.f32 %v1212_v30, %v1208_v31 }
 0xc97   :  { %v1220_v36 = vpack.c.bf16 %v1214_v35, %v1213_v33 }
 0xc99   :  { %2396 = vmatmul.mubr.msk.bf16.vlgmr.msra.gmra.mrb[16].mxu0 %vm242_vm1, %v1220_v36 }
 0xc9a   :  { %2401 = vmatprep.mubr.msk.bf16.mxu0 %vm2676_vm2, %v2675_v48 }
 0xd6c   :  { %v1270_v38 = vpop.f32.mrb[16].mxu0 }
 0xd6d   :  { %v2397_v39 = vpop.f32.mrb[17].mxu0 }
 0xd6e   :  { %v1273_v41 = vpop.f32.mrb[18].mxu0 }
 0xd6f   :  { %v2398_v42 = vpop.f32.mrb[19].mxu0  ;;  %v2521_v43 = vpack.i.bf16 %v1273_v41, %v1270_v38  ;;  %v3078_v45 = vpack.c.bf16 %v1273_v41, %v1270_v38 }
 0xd71   :  { %2522 = vrot.lane.b32.xlu1 %v2521_v43, %s2677_s9  ;;  %2517 = vrot.lane.b32.xlu0 %v2521_v43, %s2678_s10 }
 0xd75   :  { %2527 = vrot.lane.b32.xlu1 %v2521_v43, %s2679_s11 }
 0xd79   :  { %1302 = vrot.lane.b32.xlu1 %v3078_v45, %s2680_s12 }
 0xde3   :  { %v2523_v32 = vpop.permute.xlu1 %2522  ;;  %v2518_v13 = vpop.permute.xlu0 %2517 }
 0xde4   :  { %v2525_v46 = vunpack.i.h.bf16 %v2523_v32  ;;  %v2524_v47 = vunpack.i.l.bf16 %v2523_v32  ;;  %v2520_v34 = vunpack.i.h.bf16 %v2518_v13  ;;  %v2519_v50 = vunpack.i.l.bf16 %v2518_v13 }
 0xde6   :  { %v3085_v52 = vpack.c.bf16 %v2525_v46, %v2524_v47  ;;  %v3087_v53 = vpack.c.bf16 %v2520_v34, %v2519_v50 }
 0xde7   :  { %v2528_v54 = vpop.permute.xlu1 %2527 }
 0xde8   :  { %v2530_v55 = vunpack.i.h.bf16 %v2528_v54  ;;  %v2529_v56 = vunpack.i.l.bf16 %v2528_v54  ;;  %1352 = vrot.lane.b32.xlu0 %v3087_v53, %s2680_s12  ;;  %1402 = vrot.lane.b32.xlu1 %v3085_v52, %s2680_s12 }
 0xdea   :  { %v3093_v62 = vpack.c.bf16 %v2530_v55, %v2529_v56 }
 0xdeb   :  { %v1303_v63 = vpop.permute.xlu1 %1302 }
 0xdec   :  { %v1308_v59 = vsel %vm370_vm3, %v1303_v63, 0  ;;  %1452 = vrot.lane.b32.xlu0 %v3093_v62, %s2680_s12 }
 0xded   :  { %2400 = vmatpush3.bf16.xpose.msra.mxu0 %v1308_v59 }
 0xdee   :  { %2411 = vmatprep.subr.bf16.mxu0 %v2675_v48 }
 0xdf4   :  { %2402 = vmatmul.mubr.msk.bf16.vlgmr.msra.gmra.mrb[20].mxu0 %vm370_vm3, %v3078_v45 }
 0xdf5   :  { %2413 = vmatprep.mubr.msk.bf16.mxu0 %vm2676_vm2, %v2675_v48 }
 0xe5a   :  { %v1353_v37 = vpop.permute.xlu0 %1352  ;;  %v1403_v40 = vpop.permute.xlu1 %1402 }
 0xe5b   :  { %v1358_v2 = vsel %vm370_vm3, %v1353_v37, 0  ;;  %v1408_v3 = vsel %vm370_vm3, %v1403_v40, 0 }
 0xe5c   :  { %2406 = vmatpush3.bf16.xpose.msra.mxu1 %v1358_v2  ;;  %2412 = vmatpush3.bf16.xpose.msra.mxu0 %v1408_v3 }
 0xe5d   :  { %2417 = vmatprep.subr.bf16.mxu1 %v2675_v48  ;;  %2423 = vmatprep.subr.bf16.mxu0 %v2675_v48 }
 0xe5e   :  { %v1453_v4 = vpop.permute.xlu0 %1452 }
 0xe5f   :  { %v1458_v6 = vsel %vm370_vm3, %v1453_v4, 0 }
 0xe63   :  { %2408 = vmatmul.mubr.msk.bf16.vlgmr.msra.gmra.mrb[36].mxu1 %vm370_vm3, %v3087_v53  ;;  %2414 = vmatmul.mubr.msk.bf16.vlgmr.msra.gmra.mrb[24].mxu0 %vm370_vm3, %v3085_v52 }
 0xe64   :  { %2418 = vmatpush3.bf16.xpose.msra.mxu1 %v1458_v6  ;;  %2419 = vmatprep.mubr.msk.bf16.mxu1 %vm2676_vm2, %v2675_v48 }
 0xe65   :  { %2425 = vmatprep.mubr.msk.bf16.mxu0 %vm2676_vm2, %v2675_v48  ;;  %2429 = vmatprep.subr.bf16.mxu1 %v2675_v48 }
 0xe6b   :  { %2420 = vmatmul.mubr.msk.bf16.vlgmr.msra.gmra.mrb[40].mxu1 %vm370_vm3, %v3093_v62 }
 0xe6c   :  { %2431 = vmatprep.mubr.msk.bf16.mxu1 %vm2676_vm2, %v2675_v48 }
 0xec7   :  { %v1344_v7 = vpop.f32.mrb[20].mxu0 }
 0xec8   :  { %v1501_v8 = vmul.f32 0.35355338, %v1344_v7  ;;  %v2403_v9 = vpop.f32.mrb[21].mxu0 }
 0xec9   :  { %v1347_v10 = vpop.f32.mrb[22].mxu0 }
 0xeca   :  { %v1502_v11 = vmul.f32 0.35355338, %v1347_v10  ;;  %v2404_v12 = vpop.f32.mrb[23].mxu0  ;;  %v1509_v14 = vadd.f32 %v1501_v8, %v2890_v44 }
 0xecc   :  { %v1517_v15 = vsel %vm584_vm9, %v1509_v14, -inf  ;;  %v1510_v16 = vadd.f32 %v1502_v11, %v2892_v49 }
 0xecd   :  { %1518 = vmax.xlane.f32.xlu1 %v1517_v15 }
 0xece   :  { %v1520_v17 = vsel %vm584_vm9, %v1510_v16, -inf }
 0xecf   :  { %1521 = vmax.xlane.f32.xlu0 %v1520_v17 }
 0xf36   :  { %v1394_v18 = vpop.f32.mrb[36].mxu1  ;;  %v1444_v22 = vpop.f32.mrb[24].mxu0 }
 0xf37   :  { %v1503_v23 = vmul.f32 0.35355338, %v1394_v18  ;;  %v1505_v20 = vmul.f32 0.35355338, %v1444_v22  ;;  %v2409_v25 = vpop.f32.mrb[37].mxu1  ;;  %v2415_v21 = vpop.f32.mrb[25].mxu0 }
 0xf38   :  { %v1397_v26 = vpop.f32.mrb[38].mxu1  ;;  %v1447_v27 = vpop.f32.mrb[26].mxu0 }
 0xf39   :  { %v1504_v28 = vmul.f32 0.35355338, %v1397_v26  ;;  %v2410_v30 = vpop.f32.mrb[39].mxu1  ;;  %v2416_v31 = vpop.f32.mrb[27].mxu0  ;;  %v1513_v33 = vadd.f32 %v1505_v20, %v2890_v44  ;;  %v1511_v35 = vadd.f32 %v1503_v23, %v2890_v44  ;;  %v1506_v36 = vmul.f32 0.35355338, %v1447_v27 }
 0xf3b   :  { %v1529_v38 = vsel %vm584_vm9, %v1513_v33, -inf  ;;  %v1523_v39 = vsel %vm584_vm9, %v1511_v35, -inf  ;;  %v1512_v41 = vadd.f32 %v1504_v28, %v2892_v49  ;;  %v1514_v46 = vadd.f32 %v1506_v36, %v2892_v49 }
 0xf3c   :  { %1530 = vmax.xlane.f32.xlu1 %v1529_v38  ;;  %1524 = vmax.xlane.f32.xlu0 %v1523_v39 }
 0xf3d   :  { %v1526_v13 = vsel %vm584_vm9, %v1512_v41, -inf  ;;  %v1532_v55 = vsel %vm584_vm9, %v1514_v46, -inf }
 0xf3e   :  { %v1494_v42 = vpop.f32.mrb[40].mxu1 }
 0xf3f   :  { %v1507_v43 = vmul.f32 0.35355338, %v1494_v42  ;;  %v2421_v32 = vpop.f32.mrb[41].mxu1 }
 0xf40   :  { %1527 = vmax.xlane.f32.xlu0 %v1526_v13  ;;  %v1497_v47 = vpop.f32.mrb[42].mxu1 }
 0xf41   :  { %v1508_v34 = vmul.f32 0.35355338, %v1497_v47  ;;  %v2422_v50 = vpop.f32.mrb[43].mxu1  ;;  %v1515_v54 = vadd.f32 %v1507_v43, %v2890_v44 }
 0xf43   :  { %v1535_v56 = vsel %vm584_vm9, %v1515_v54, -inf  ;;  %v1516_v63 = vadd.f32 %v1508_v34, %v2892_v49 }
 0xf44   :  { %1533 = vmax.xlane.f32.xlu0 %v1532_v55  ;;  %1536 = vmax.xlane.f32.xlu1 %v1535_v56 }
 0xf45   :  { %v1538_v59 = vsel %vm584_vm9, %v1516_v63, -inf }
 0xf48   :  { %1539 = vmax.xlane.f32.xlu0 %v1538_v59 }
 0xf55   :  { %1609 = vrot.lane.b32.xlu1 %v3078_v45, %s2682_s13 }
 0xf5a   :  { %v1519_v3 = vpop.xlane.xlu1 %1518 }
 0xf5b   :  { %v1541_v44 = vsub.f32 %v1509_v14, %v1519_v3 }
 0xf5c   :  { %v1522_v37 = vpop.xlane.xlu0 %1521 }
 0xf5d   :  { %v1542_v40 = vsub.f32 %v1510_v16, %v1522_v37  ;;  %v1549_v4 = vmul.f32 1.442695, %v1541_v44 }
 0xf5f   :  { %v1551_v2 = vmul.f32 1.442695, %v1542_v40 }
 0xf61   :  { %2630 = vpow2.f32 %v1551_v2 }
 0xf62   :  { %2632 = vpow2.f32 %v1549_v4 }
 0xf6b   :  { %v2631_v6 = vpop.eup %2630 }
 0xf6c   :  { %v1568_v7 = vsel %vm584_vm9, %v2631_v6, 0.0  ;;  %v2633_v49 = vpop.eup %2632 }
 0xf6d   :  { %1569 = vadd.xlane.f32.xlu0 %v1568_v7  ;;  %v1565_v8 = vsel %vm584_vm9, %v2633_v49, 0.0 }
 0xf79   :  { %1566 = vadd.xlane.f32.xlu1 %v1565_v8 }
 0xfc9   :  { %v1531_v9 = vpop.xlane.xlu1 %1530  ;;  %v1525_v10 = vpop.xlane.xlu0 %1524 }
 0xfca   :  { %v1545_v11 = vsub.f32 %v1513_v33, %v1531_v9  ;;  %v1543_v45 = vsub.f32 %v1511_v35, %v1525_v10 }
 0xfcc   :  { %v1553_v12 = vmul.f32 1.442695, %v1543_v45  ;;  %v1557_v15 = vmul.f32 1.442695, %v1545_v11 }
 0xfcd   :  { %v1528_v16 = vpop.xlane.xlu0 %1527 }
 0xfce   :  { %v1544_v17 = vsub.f32 %v1512_v41, %v1528_v16  ;;  %2634 = vpow2.f32 %v1553_v12 }
 0xfcf   :  { %2636 = vpow2.f32 %v1557_v15 }
 0xfd0   :  { %v1555_v14 = vmul.f32 1.442695, %v1544_v17 }
 0xfd1   :  { %v1534_v18 = vpop.xlane.xlu0 %1533  ;;  %v1537_v22 = vpop.xlane.xlu1 %1536 }
 0xfd2   :  { %2638 = vpow2.f32 %v1555_v14  ;;  %v1546_v23 = vsub.f32 %v1514_v46, %v1534_v18  ;;  %v1547_v20 = vsub.f32 %v1515_v54, %v1537_v22 }
 0xfd4   :  { %v1559_v25 = vmul.f32 1.442695, %v1546_v23  ;;  %v1561_v21 = vmul.f32 1.442695, %v1547_v20 }
 0xfd5   :  { %v1610_v26 = vpop.permute.xlu1 %1609  ;;  %v1540_v27 = vpop.xlane.xlu0 %1539 }
 0xfd6   :  { %2640 = vpow2.f32 %v1559_v25  ;;  %v1548_v28 = vsub.f32 %v1516_v63, %v1540_v27  ;;  %2424 = vmatpush3.bf16.msra.mxu0 %v1610_v26 }
 0xfd7   :  { %2642 = vpow2.f32 %v1561_v21  ;;  %2435 = vmatprep.subr.bf16.mxu0 %v2675_v48  ;;  %v2574_v21 = vld [vmem:[%s3274_s6 + $0x30] sm:$0xff]  }
 0xfd8   :  { %v1563_v30 = vmul.f32 1.442695, %v1548_v28  ;;  %v2635_v31 = vpop.eup %2634  ;;  %v2575_v28 = vld [vmem:[%s3274_s6 + $0x38] sm:$0xff]  }
 0xfd9   :  { %v1571_v33 = vsel %vm584_vm9, %v2635_v31, 0.0  ;;  %v2637_v35 = vpop.eup %2636 }
 0xfda   :  { %2644 = vpow2.f32 %v1563_v30  ;;  %1572 = vadd.xlane.f32.xlu1 %v1571_v33  ;;  %v1577_v39 = vsel %vm584_vm9, %v2637_v35, 0.0 }
 0xfdc   :  { %v2639_v36 = vpop.eup %2638 }
 0xfdd   :  { %v1574_v38 = vsel %vm584_vm9, %v2639_v36, 0.0 }
 0xfde   :  { %1575 = vadd.xlane.f32.xlu0 %v1574_v38  ;;  %1578 = vadd.xlane.f32.xlu1 %v1577_v39 }
 0xfe0   :  { %v2641_v41 = vpop.eup %2640 }
 0xfe1   :  { %v2643_v42 = vpop.eup %2642  ;;  %v1580_v43 = vsel %vm584_vm9, %v2641_v41, 0.0 }
 0xfe2   :  { %v1583_v32 = vsel %vm584_vm9, %v2643_v42, 0.0  ;;  %1581 = vadd.xlane.f32.xlu0 %v1580_v43 }
 0xfe3   :  { %1584 = vadd.xlane.f32.xlu1 %v1583_v32 }
 0xfe4   :  { %v2645_v13 = vpop.eup %2644 }
 0xfe5   :  { %v1586_v46 = vsel %vm584_vm9, %v2645_v13, 0.0 }
 0xfe6   :  { %1587 = vadd.xlane.f32.xlu0 %v1586_v46 }
 0xff4   :  { %1703 = vrot.lane.b32.xlu1 %v3085_v52, %s2682_s13 }
 0xff8   :  { %1750 = vrot.lane.b32.xlu1 %v3093_v62, %s2682_s13 }
 0xffa   :  { %v1570_v47 = vpop.xlane.xlu0 %1569 }
 0xffb   :  { %2646 = vrcp.f32 %v1570_v47 }
 0xffc   :  { %1656 = vrot.lane.b32.xlu0 %v3087_v53, %s2682_s13 }
0x1005   :  { %v2647_v50 = vpop.eup %2646 }
0x1006   :  { %v1567_v34 = vpop.xlane.xlu1 %1566  ;;  %v1598_v55 = vmul.f32 %v2647_v50, %v2631_v6 }
0x1007   :  { %2648 = vrcp.f32 %v1567_v34 }
0x1011   :  { %v2649_v54 = vpop.eup %2648 }
0x1012   :  { %v1597_v56 = vmul.f32 %v2649_v54, %v2633_v49 }
0x1014   :  { %v1605_v63 = vpack.c.bf16 %v1598_v55, %v1597_v56 }
0x1016   :  { %2426 = vmatmul.mubr.msk.bf16.vlgmr.msra.gmra.mrb[28].mxu0 %vm584_vm9, %v1605_v63 }
0x1017   :  { %2437 = vmatprep.mubr.msk.bf16.mxu0 %vm2676_vm2, %v2675_v48 }
0x1067   :  { %v1573_v52 = vpop.xlane.xlu1 %1572 }
0x1068   :  { %2650 = vrcp.f32 %v1573_v52 }
0x106b   :  { %v1576_v62 = vpop.xlane.xlu0 %1575  ;;  %v1579_v59 = vpop.xlane.xlu1 %1578 }
0x106c   :  { %2652 = vrcp.f32 %v1576_v62 }
0x106d   :  { %2654 = vrcp.f32 %v1579_v59 }
0x106f   :  { %v1582_v53 = vpop.xlane.xlu0 %1581 }
0x1070   :  { %v1585_v37 = vpop.xlane.xlu1 %1584  ;;  %2656 = vrcp.f32 %v1582_v53 }
0x1071   :  { %2658 = vrcp.f32 %v1585_v37 }
0x1072   :  { %v2651_v2 = vpop.eup %2650 }
0x1073   :  { %v1588_v40 = vpop.xlane.xlu0 %1587  ;;  %v1599_v4 = vmul.f32 %v2651_v2, %v2635_v31 }
0x1074   :  { %v1704_v3 = vpop.permute.xlu1 %1703  ;;  %2660 = vrcp.f32 %v1588_v40 }
0x1075   :  { %2436 = vmatpush3.bf16.msra.mxu0 %v1704_v3 }
0x1076   :  { %v2653_v44 = vpop.eup %2652  ;;  %2447 = vmatprep.subr.bf16.mxu0 %v2675_v48 }
0x1077   :  { %v1600_v6 = vmul.f32 %v2653_v44, %v2639_v36  ;;  %v1657_v7 = vpop.permute.xlu0 %1656  ;;  %v2655_v49 = vpop.eup %2654 }
0x1078   :  { %2430 = vmatpush3.bf16.msra.mxu1 %v1657_v7  ;;  %v1601_v10 = vmul.f32 %v2655_v49, %v2637_v35  ;;  %v1751_v45 = vpop.permute.xlu1 %1750 }
0x1079   :  { %v1606_v8 = vpack.c.bf16 %v1600_v6, %v1599_v4  ;;  %2441 = vmatprep.subr.bf16.mxu1 %v2675_v48  ;;  %v1889_v4 = vrot.slane %v3069_v24, %v957_v29 }
0x107a   :  { %v2657_v9 = vpop.eup %2656 }
0x107b   :  { %v1602_v11 = vmul.f32 %v2657_v9, %v2641_v41  ;;  %2432 = vmatmul.mubr.msk.bf16.vlgmr.msra.gmra.mrb[44].mxu1 %vm584_vm9, %v1606_v8  ;;  %v2659_v12 = vpop.eup %2658 }
0x107c   :  { %2442 = vmatpush3.bf16.msra.mxu1 %v1751_v45  ;;  %2443 = vmatprep.mubr.msk.bf16.mxu1 %vm2676_vm2, %v2675_v48  ;;  %v1603_v17 = vmul.f32 %v2659_v12, %v2643_v42 }
0x107d   :  { %v1607_v15 = vpack.c.bf16 %v1602_v11, %v1601_v10  ;;  %2455 = vmatprep.subr.bf16.mxu1 %v2675_v48 }
0x107e   :  { %v2661_v16 = vpop.eup %2660 }
0x107f   :  { %v1604_v14 = vmul.f32 %v2661_v16, %v2645_v13  ;;  %2438 = vmatmul.mubr.msk.bf16.vlgmr.msra.gmra.mrb[32].mxu0 %vm584_vm9, %v1607_v15 }
0x1080   :  { %2451 = vmatprep.mubr.msk.bf16.mxu0 %vm2676_vm2, %v2675_v48  ;;  %2448 = vmatpush3.bf16.msra.mxu0 %v2574_v21  ;;  %v2577_v21 = vld [vmem:[%s3275_s5 + $0x18] sm:$0xff]  }
0x1081   :  { %v1608_v18 = vpack.c.bf16 %v1604_v14, %v1603_v17  ;;  %2449 = vmatprep.subr.bf16.mxu0 %v2675_v48 }
0x1083   :  { %2444 = vmatmul.mubr.msk.bf16.vlgmr.msra.gmra.mrb[48].mxu1 %vm584_vm9, %v1608_v18 }
0x1084   :  { %2459 = vmatprep.mubr.msk.bf16.mxu1 %vm2676_vm2, %v2675_v48  ;;  %2450 = vmatpush3.bf16.msra.mxu0 %v2575_v28 }
0x1085   :  { %2463 = vmatprep.subr.bf16.mxu0 %v2675_v48 }
0x10e9   :  { %v1649_v22 = vpop.f32.mrb[28].mxu0 }
0x10ea   :  { %v2427_v23 = vpop.f32.mrb[29].mxu0 }
0x10eb   :  { %v1652_v20 = vpop.f32.mrb[30].mxu0 }
0x10ec   :  { %v2428_v25 = vpop.f32.mrb[31].mxu0 }
0x10ed   :  { %v2576_v25 = vld [vmem:[%s3275_s5 + $0x10] sm:$0xff]  }
0x10ee   :  { %2456 = vmatpush3.bf16.msra.mxu1 %v2576_v25 }
0x10ef   :  { %2457 = vmatprep.subr.bf16.mxu1 %v2675_v48 }
0x10f2   :  { %2458 = vmatpush3.bf16.msra.mxu1 %v2577_v21 }
0x114e   :  { %v1696_v26 = vpop.f32.mrb[44].mxu1 }
0x114f   :  { %v2433_v27 = vpop.f32.mrb[45].mxu1 }
0x1150   :  { %v1699_v30 = vpop.f32.mrb[46].mxu1 }
0x1151   :  { %v2531_v31 = vpack.i.bf16 %v1699_v30, %v1696_v26  ;;  %v2434_v33 = vpop.f32.mrb[47].mxu1 }
0x1152   :  { %v1743_v35 = vpop.f32.mrb[32].mxu0 }
0x1153   :  { %v2439_v36 = vpop.f32.mrb[33].mxu0  ;;  %2532 = vrot.lane.b32.xlu1 %v2531_v31, %s2683_s18 }
0x1154   :  { %v1746_v38 = vpop.f32.mrb[34].mxu0  ;;  %v1921_v36 = vrot.slane %v3069_v24, %v989_v1  ;;  %v2579_v1 = vld [vmem:[%s3274_s6 + $0x48] sm:$0xff]  }
0x1155   :  { %v2536_v39 = vpack.i.bf16 %v1746_v38, %v1743_v35  ;;  %v2440_v41 = vpop.f32.mrb[35].mxu0 }
0x1156   :  { %v1790_v42 = vpop.f32.mrb[48].mxu1 }
0x1157   :  { %2537 = vrot.lane.b32.xlu0 %v2536_v39, %s2684_s19  ;;  %v2445_v43 = vpop.f32.mrb[49].mxu1 }
0x1158   :  { %v1793_v32 = vpop.f32.mrb[50].mxu1  ;;  %v1927_v43 = vrot.slane %v3069_v24, %v995_v5  ;;  %v2580_v5 = vld [vmem:[%s3274_s6 + $0x50] sm:$0xff]  }
0x1159   :  { %v2541_v13 = vpack.i.bf16 %v1793_v32, %v1790_v42  ;;  %v2446_v46 = vpop.f32.mrb[51].mxu1 }
0x115b   :  { %2542 = vrot.lane.b32.xlu1 %v2541_v13, %s2685_s20 }
0x11c5   :  { %v2533_v47 = vpop.permute.xlu1 %2532 }
0x11c6   :  { %v2535_v50 = vunpack.i.h.bf16 %v2533_v47  ;;  %v2534_v54 = vunpack.i.l.bf16 %v2533_v47 }
0x11c8   :  { %v1822_v52 = vsel %vm370_vm3, %v1652_v20, %v2535_v50  ;;  %v1821_v62 = vsel %vm370_vm3, %v1649_v22, %v2534_v54  ;;  %v2581_v50 = vld [vmem:[%s3274_s6 + $0x58] sm:$0xff]   ;;  %v1939_v54 = vrot.slane %v3069_v24, %v1006_v19 }
0x11c9   :  { %v2538_v34 = vpop.permute.xlu0 %2537 }
0x11ca   :  { %v2540_v55 = vunpack.i.h.bf16 %v2538_v34  ;;  %v2539_v56 = vunpack.i.l.bf16 %v2538_v34  ;;  %v2578_v34 = vld [vmem:[%s3274_s6 + $0x40] sm:$0xff]  }
0x11cc   :  { %v1823_v37 = vsel %vm584_vm9, %v1821_v62, %v2539_v56  ;;  %v1824_v40 = vsel %vm584_vm9, %v1822_v52, %v2540_v55 }
0x11cd   :  { %v2543_v63 = vpop.permute.xlu1 %2542 }
0x11ce   :  { %v2545_v59 = vunpack.i.h.bf16 %v2543_v63  ;;  %v2544_v53 = vunpack.i.l.bf16 %v2543_v63 }
0x11d0   :  { %v1826_v2 = vsel %vm893_vm10, %v1824_v40, %v2545_v59  ;;  %v1825_v3 = vsel %vm893_vm10, %v1823_v37, %v2544_v53 }
0x11d1   :  { %v1827_v44 = vpack.c.bf16 %v1826_v2, %v1825_v3 }
0x11d3   :  { %2452 = vmatmul.mubr.msk.bf16.vlgmr.msra.gmra.mrb[36].mxu0 %vm242_vm1, %v1827_v44 }
0x11d4   :  { %2471 = vmatprep.mubr.msk.bf16.mxu0 %vm2676_vm2, %v2675_v48  ;;  %2464 = vmatpush3.bf16.msra.mxu0 %v2578_v34 }
0x11d5   :  { %2465 = vmatprep.subr.bf16.mxu0 %v2675_v48 }
0x11d8   :  { %2466 = vmatpush3.bf16.msra.mxu0 %v2579_v1 }
0x11d9   :  { %2467 = vmatprep.subr.bf16.mxu0 %v2675_v48 }
0x11dc   :  { %2468 = vmatpush3.bf16.msra.mxu0 %v2580_v5 }
0x11dd   :  { %2469 = vmatprep.subr.bf16.mxu0 %v2675_v48 }
0x11e0   :  { %2470 = vmatpush3.bf16.msra.mxu0 %v2581_v50 }
0x12a6   :  { %v1877_v6 = vpop.f32.mrb[36].mxu0 }
0x12a7   :  { %v1884_v7 = vadd.f32 %v1877_v6, %v3035_v60  ;;  %v2453_v49 = vpop.f32.mrb[37].mxu0 }
0x12a8   :  { %v1880_v8 = vpop.f32.mrb[38].mxu0 }
0x12a9   :  { %v3193_v9 = vadd.f32 %v1889_v4, %v1884_v7  ;;  %v1885_v10 = vadd.f32 %v1880_v8, %v3043_v0  ;;  %v2454_v11 = vpop.f32.mrb[39].mxu0 }
0x12ab   :  { %v3196_v45 = vadd.f32 %v1889_v4, %v1885_v10  ;;  %v1892_v12 = vsel %vm242_vm1, %v3193_v9, 0.0 }
0x12ac   :  { %1893 = vadd.xlane.f32.xlu0 %v1892_v12 }
0x12ad   :  { %v1895_v15 = vsel %vm242_vm1, %v3196_v45, 0.0 }
0x12ae   :  { %1896 = vadd.xlane.f32.xlu1 %v1895_v15 }
0x1339   :  { %v1894_v29 = vpop.xlane.xlu0 %1893 }
0x133a   :  { %v1898_v16 = vmul.f32 0.03125, %v1894_v29 }
0x133b   :  { %v1897_v60 = vpop.xlane.xlu1 %1896 }
0x133c   :  { %v1900_v17 = vsub.f32 %v3193_v9, %v1898_v16  ;;  %v1899_v14 = vmul.f32 0.03125, %v1897_v60  ;;  %v2088_v60 = vrot.slane %v3069_v24, %v1156_v51 }
0x133e   :  { %v1901_v18 = vsub.f32 %v3196_v45, %v1899_v14  ;;  %v1902_v0 = vmul.f32 %v1900_v17, %v1900_v17 }
0x1340   :  { %v1904_v22 = vsel %vm242_vm1, %v1902_v0, 0.0  ;;  %v1903_v23 = vmul.f32 %v1901_v18, %v1901_v18 }
0x1341   :  { %1905 = vadd.xlane.f32.xlu0 %v1904_v22 }
0x1342   :  { %v1907_v20 = vsel %vm242_vm1, %v1903_v23, 0.0 }
0x1345   :  { %1908 = vadd.xlane.f32.xlu0 %v1907_v20 }
0x13ce   :  { %v1906_v26 = vpop.xlane.xlu0 %1905 }
0x13cf   :  { %v1910_v27 = vmul.f32 0.03125, %v1906_v26 }
0x13d1   :  { %v1912_v28 = vadd.f32 1e-05, %v1910_v27 }
0x13d2   :  { %v1909_v30 = vpop.xlane.xlu0 %1908 }
0x13d3   :  { %2662 = vrsqrt.f32 %v1912_v28  ;;  %v1911_v31 = vmul.f32 0.03125, %v1909_v30 }
0x13d5   :  { %v1913_v33 = vadd.f32 1e-05, %v1911_v31 }
0x13d7   :  { %2664 = vrsqrt.f32 %v1913_v33 }
0x13dd   :  { %v2663_v35 = vpop.eup %2662 }
0x13de   :  { %v1916_v38 = vmul.f32 %v2663_v35, %v1900_v17 }
0x13e0   :  { %v1922_v41 = vmul.f32 %v1921_v36, %v1916_v38 }
0x13e1   :  { %v2665_v39 = vpop.eup %2664 }
0x13e2   :  { %v1917_v42 = vmul.f32 %v2665_v39, %v1901_v18  ;;  %v1928_v13 = vadd.f32 %v1927_v43, %v1922_v41 }
0x13e4   :  { %v1923_v32 = vmul.f32 %v1921_v36, %v1917_v42 }
0x13e6   :  { %v1929_v46 = vadd.f32 %v1927_v43, %v1923_v32  ;;  %v2674_v43 = vld [vmem:[%s3271_s1] sm:$0xff] }
0x13e7   :  { %v2123_v32 = vrot.slane %v2674_v43, %v2827_v58 }
0x13e8   :  { %v1935_v47 = vpack.c.bf16 %v1929_v46, %v1928_v13  ;;  %v2129_v46 = vrot.slane %v2674_v43, %v2835_v61 }
0x13ea   :  { %2460 = vmatmul.mubr.msk.bf16.vlgmr.msra.gmra.mrb[52].mxu1 %vm242_vm1, %v1935_v47 }
0x14bd   :  { %v1989_v55 = vpop.f32.mrb[52].mxu1 }
0x14be   :  { %v1990_v56 = vadd.f32 %v1989_v55, %v1939_v54  ;;  %v2461_v63 = vpop.f32.mrb[53].mxu1 }
0x14bf   :  { %v1992_v52 = vpop.f32.mrb[54].mxu1 }
0x14c0   :  { %v1998_v62 = vmul.f32 0.044715, %v1990_v56  ;;  %v1993_v59 = vadd.f32 %v1992_v52, %v1939_v54  ;;  %v2462_v53 = vpop.f32.mrb[55].mxu1  ;;  %v1996_v10 = vmul.f32 0.5, %v1990_v56 }
0x14c2   :  { %v2000_v37 = vmul.f32 %v1998_v62, %v1990_v56  ;;  %v1999_v40 = vmul.f32 0.044715, %v1993_v59  ;;  %v1997_v11 = vmul.f32 0.5, %v1993_v59 }
0x14c4   :  { %v2002_v2 = vmul.f32 %v2000_v37, %v1990_v56  ;;  %v2001_v3 = vmul.f32 %v1999_v40, %v1993_v59 }
0x14c6   :  { %v2004_v44 = vadd.f32 %v2002_v2, %v1990_v56  ;;  %v2003_v4 = vmul.f32 %v2001_v3, %v1993_v59 }
0x14c8   :  { %v2006_v6 = vmul.f32 0.7978846, %v2004_v44  ;;  %v2005_v48 = vadd.f32 %v2003_v4, %v1993_v59 }
0x14ca   :  { %2666 = vtanh.f32 %v2006_v6  ;;  %v2007_v7 = vmul.f32 0.7978846, %v2005_v48 }
0x14cc   :  { %2668 = vtanh.f32 %v2007_v7 }
0x14d4   :  { %v2667_v49 = vpop.eup %2666 }
0x14d5   :  { %v2010_v19 = vadd.f32 1.0, %v2667_v49 }
0x14d6   :  { %v2669_v8 = vpop.eup %2668 }
0x14d7   :  { %v2011_v12 = vadd.f32 1.0, %v2669_v8  ;;  %v2012_v15 = vmul.f32 %v2010_v19, %v1996_v10 }
0x14d9   :  { %v2013_v29 = vmul.f32 %v2011_v12, %v1997_v11 }
0x14db   :  { %v2014_v16 = vpack.c.bf16 %v2013_v29, %v2012_v15 }
0x14dd   :  { %2472 = vmatmul.mubr.msk.bf16.vlgmr.msra.gmra.mrb[40].mxu0 %vm1107_vm11, %v2014_v16 }
0x15b0   :  { %v2076_v17 = vpop.f32.mrb[40].mxu0 }
0x15b1   :  { %v2083_v14 = vadd.f32 %v2076_v17, %v3193_v9  ;;  %v2473_v18 = vpop.f32.mrb[41].mxu0 }
0x15b2   :  { %v2079_v0 = vpop.f32.mrb[42].mxu0 }
0x15b3   :  { %v2089_v22 = vadd.f32 %v2088_v60, %v2083_v14  ;;  %v2084_v23 = vadd.f32 %v2079_v0, %v3196_v45  ;;  %v2474_v20 = vpop.f32.mrb[43].mxu0 }
0x15b5   :  { %2223 = vst.msk [vmem:[%s3276_s8 + $0x10] sm:$0xff] %vm242_vm1, %v2089_v22  ;;  %v2090_v25 = vadd.f32 %v2088_v60, %v2084_v23  ;;  %v2094_v21 = vsel %vm242_vm1, %v2089_v22, 0.0 }
0x15b6   :  { %2095 = vadd.xlane.f32.xlu0 %v2094_v21 }
0x15b7   :  { %2224 = vst.msk [vmem:[%s3276_s8 + $0x18] sm:$0xff] %vm242_vm1, %v2090_v25  ;;  %v2097_v57 = vsel %vm242_vm1, %v2090_v25, 0.0 }
0x15b8   :  { %2098 = vadd.xlane.f32.xlu1 %v2097_v57 }
0x1643   :  { %v2096_v51 = vpop.xlane.xlu0 %2095 }
0x1644   :  { %v2100_v24 = vmul.f32 0.03125, %v2096_v51 }
0x1645   :  { %v2099_v9 = vpop.xlane.xlu1 %2098 }
0x1646   :  { %v2102_v45 = vsub.f32 %v2089_v22, %v2100_v24  ;;  %v2101_v26 = vmul.f32 0.03125, %v2099_v9 }
0x1648   :  { %v2103_v27 = vsub.f32 %v2090_v25, %v2101_v26  ;;  %v2104_v28 = vmul.f32 %v2102_v45, %v2102_v45 }
0x164a   :  { %v2106_v30 = vsel %vm242_vm1, %v2104_v28, 0.0  ;;  %v2105_v31 = vmul.f32 %v2103_v27, %v2103_v27 }
0x164b   :  { %2107 = vadd.xlane.f32.xlu0 %v2106_v30 }
0x164c   :  { %v2109_v33 = vsel %vm242_vm1, %v2105_v31, 0.0 }
0x164d   :  { %2110 = vadd.xlane.f32.xlu1 %v2109_v33 }
0x16d8   :  { %v2108_v35 = vpop.xlane.xlu0 %2107 }
0x16d9   :  { %v2112_v36 = vmul.f32 0.03125, %v2108_v35 }
0x16da   :  { %v2111_v38 = vpop.xlane.xlu1 %2110 }
0x16db   :  { %v2114_v39 = vadd.f32 1e-05, %v2112_v36  ;;  %v2113_v41 = vmul.f32 0.03125, %v2111_v38 }
0x16dd   :  { %2670 = vrsqrt.f32 %v2114_v39  ;;  %v2115_v42 = vadd.f32 1e-05, %v2113_v41 }
0x16df   :  { %2672 = vrsqrt.f32 %v2115_v42 }
0x16e7   :  { %v2671_v13 = vpop.eup %2670 }
0x16e8   :  { %v2118_v47 = vmul.f32 %v2671_v13, %v2102_v45 }
0x16e9   :  { %v2673_v34 = vpop.eup %2672 }
0x16ea   :  { %v2124_v1 = vmul.f32 %v2123_v32, %v2118_v47  ;;  %v2119_v5 = vmul.f32 %v2673_v34, %v2103_v27 }
0x16ec   :  { %v2130_v50 = vadd.f32 %v2129_v46, %v2124_v1  ;;  %v2125_v54 = vmul.f32 %v2123_v32, %v2119_v5 }
0x16ee   :  { %2132 = vst.msk [vmem:[%s3277_s7] sm:$0xff] %vm242_vm1, %v2130_v50  ;;  %v2131_v55 = vadd.f32 %v2129_v46, %v2125_v54 }
0x16f0   :  { %2133 = vst.msk [vmem:[%s3277_s7 + $0x8] sm:$0xff] %vm242_vm1, %v2131_v55 }

</bundles_post_ra>
